<compile_context>
chip_gen: v5e
topology: v5e:2x2
jax: 0.10.0
libtpu: 0.0.40
codegen_flags: <defaults>
</compile_context>

<pallas_src>
import functools

import jax
import jax.numpy as jnp
import numpy as np
from jax.experimental import pallas as pl
from jax.experimental.pallas import tpu as pltpu

_LN_EPS = 1e-6
_SQRT_2_OVER_PI = 0.7978845608028654


def _gelu_tanh(x):
    # tanh-approximate GELU (== torch.nn.GELU(approximate='tanh')); tanh runs on
    # the EUP slot, so the VALU cost is a handful of ops per element.
    # TODO(synk): torch.nn.GELU() default is the exact erf form; the tanh
    # approximation deviates from it by at most ~3e-4 (within this script's 1e-3
    # comparison tolerance).
    return 0.5 * x * (1.0 + jnp.tanh(_SQRT_2_OVER_PI * (x + 0.044715 * x * x * x)))


def _make_tap_masks(H, W, k, HWp):
    """Per-tap zero-padding masks on the flattened (lane-padded) spatial axis."""
    p = k // 2
    HW = H * W
    rows = np.repeat(np.arange(H), W)
    cols = np.tile(np.arange(W), H)
    masks = np.zeros((k * k, HWp), np.float32)
    for di in range(k):
        for dj in range(k):
            sy, sx = p - di, p - dj
            ok = ((rows >= sy) & (rows < H + sy) &
                  (cols >= sx) & (cols < W + sx))
            masks[di * k + dj, :HW] = ok.astype(np.float32)
    return jnp.asarray(masks)


def _vmem_capacity_bytes():
    try:
        return int(pltpu.get_tpu_info().vmem_capacity_bytes)
    except Exception:
        return 64 * 2**20            # conservative default: v7x per-TC VMEM


def _pick_bt(B, C, HWp, in_itemsize, vmem_cap):
    """Batch elements per grid step, sized against the real VMEM budget."""
    live_f32 = 8 * C * HWp * 4                   # ~concurrent f32 slabs / element
    pipelined = 2 * 2 * C * HWp * in_itemsize    # double-buffered in + out blocks
    per_elem = live_f32 + pipelined
    budget = vmem_cap // 2                       # headroom: params/masks/scratch
    bt = max(1, min(B, budget // max(per_elem, 1)))
    if B >= 2:
        bt = min(bt, B // 2)   # >= 2 grid steps so v7x's 2 TCs can both be used
    bt = max(bt, 1)
    while B % bt:              # keep the grid exact
        bt -= 1
    return bt


def _convscatt_kernel(x_ref, p_ref, m_ref, out_ref, *, k, Cr, H, W):
    HW = H * W
    kk = k * k
    C = x_ref.shape[1]
    HWp = x_ref.shape[2]
    padded = HWp != HW
    inv_hw = 1.0 / HW
    inv_c = 1.0 / C

    P = p_ref[...]                       # (C, Ncols) packed per-channel params
    w_taps = P[:, :kk]                   # depthwise kxk taps, one column per tap
    o = kk
    b_a2 = P[:, o:o + 1]; o += 1
    ln_g = P[:, o:o + 1]; o += 1
    ln_b = P[:, o:o + 1]; o += 1
    w_a1 = P[:, o:o + 1]; o += 1
    b_a1 = P[:, o:o + 1]; o += 1
    w_v = P[:, o:o + 1]; o += 1
    b_v = P[:, o:o + 1]; o += 1
    w_p = P[:, o:o + 1]; o += 1
    b_p = P[:, o:o + 1]; o += 1
    w1t = P[:, o:o + Cr]; o += Cr        # fc1 weight, transposed: (C, Cr)
    w2 = P[:, o:o + Cr]                  # fc2 weight: (C, Cr)

    masks = m_ref[...]                   # (k*k, HWp) spatial-border masks
    center = (k // 2) * k + (k // 2)
    lane_valid = masks[center:center + 1, :] if padded else None   # (1, HWp)

    def cacm(t, mask_pool):
        # squeeze-excite: global avg pool -> fc1 -> relu -> fc2 -> sigmoid -> scale
        src = t * lane_valid if (padded and mask_pool) else t
        pool = jnp.sum(src, axis=-1) * inv_hw                        # (Bt, C)
        z = jnp.maximum(
            jnp.dot(pool, w1t, preferred_element_type=jnp.float32), 0.0)  # (Bt,Cr)
        s = jax.lax.dot_general(
            z, w2, dimension_numbers=(((1,), (1,)), ((), ())),
            preferred_element_type=jnp.float32)                      # (Bt, C)
        return t * jax.nn.sigmoid(s)[:, :, None]

    def layernorm_cf(t):
        # channels_first LayerNorm: normalize over the channel (sublane) axis
        u = jnp.sum(t, axis=1, keepdims=True) * inv_c                # (Bt, 1, HWp)
        d = t - u
        var = jnp.sum(d * d, axis=1, keepdims=True) * inv_c          # biased var
        return ln_g * (d * jax.lax.rsqrt(var + _LN_EPS)) + ln_b

    def dwconv(t):
        # depthwise kxk conv, zero padding k//2, via XLU lane rotation per tap
        p_pad = k // 2
        acc = None
        for di in range(k):
            for dj in range(k):
                idx = di * k + dj
                sy, sx = p_pad - di, p_pad - dj
                w_t = w_taps[:, idx:idx + 1]                         # (C, 1)
                if sy == 0 and sx == 0:
                    contrib = w_t * t
                else:
                    s = (sy * W + sx) % HWp
                    shifted = pltpu.roll(t, shift=s, axis=2)         # static shift
                    contrib = w_t * (shifted * masks[idx:idx + 1, :])
                acc = contrib if acc is None else acc + contrib
        return acc + b_a2

    x = x_ref[...].astype(jnp.float32)        # (Bt, C, HWp), pad lanes are zero
    x1 = cacm(x, mask_pool=False)             # x = self.cacm(x)
    y = layernorm_cf(x1)                      # y = self.norm(x)
    a = dwconv(_gelu_tanh(w_a1 * y + b_a1))   # self.att(y)
    v = w_v * y + b_v                         # self.v(y)
    y3 = cacm(a * v, mask_pool=True)          # y = self.cacm(att * v)
    out_ref[...] = (x1 + (w_p * y3 + b_p)).astype(out_ref.dtype)   # x + self.proj(y)


def convscatt_pallas(x, params, kernel_size, block_batch=None):
    B, C, H, W = x.shape
    k = kernel_size
    kk = k * k
    HW = H * W
    HWp = ((HW + 127) // 128) * 128          # lane-dense (multiple-of-128) width
    Cr = params["w_fc1"].shape[0]

    x2 = x.reshape(B, C, HW)
    if HWp != HW:
        x2 = jnp.pad(x2, ((0, 0), (0, 0), (0, HWp - HW)))

    # Pack every per-channel parameter into one (C, Ncols) matrix:
    # [taps(kk) | b_a2 | ln_g | ln_b | w_a1 | b_a1 | w_v | b_v | w_p | b_p |
    #  fc1^T(Cr) | fc2(Cr)]
    P = jnp.concatenate([
        params["w_att2"].reshape(C, kk),
        params["b_att2"].reshape(C, 1),
        params["ln_gamma"].reshape(C, 1),
        params["ln_beta"].reshape(C, 1),
        params["w_att1"].reshape(C, 1),
        params["b_att1"].reshape(C, 1),
        params["w_v"].reshape(C, 1),
        params["b_v"].reshape(C, 1),
        params["w_proj"].reshape(C, 1),
        params["b_proj"].reshape(C, 1),
        params["w_fc1"].T,
        params["w_fc2"],
    ], axis=1).astype(jnp.float32)

    masks = _make_tap_masks(H, W, k, HWp)

    vmem_cap = _vmem_capacity_bytes()
    Bt = block_batch if block_batch is not None else _pick_bt(
        B, C, HWp, x.dtype.itemsize, vmem_cap)
    Bt = max(1, min(Bt, B))
    while B % Bt:
        Bt -= 1
    vmem_limit = min(max(int(vmem_cap * 0.6), 32 * 2**20), int(vmem_cap))

    kernel = functools.partial(_convscatt_kernel, k=k, Cr=Cr, H=H, W=W)
    out = pl.pallas_call(
        kernel,
        out_shape=jax.ShapeDtypeStruct((B, C, HWp), x.dtype),
        grid=(B // Bt,),
        in_specs=[
            pl.BlockSpec((Bt, C, HWp), lambda b: (b, 0, 0)),
            pl.BlockSpec(P.shape, lambda b: (0, 0)),
            pl.BlockSpec(masks.shape, lambda b: (0, 0)),
        ],
        out_specs=pl.BlockSpec((Bt, C, HWp), lambda b: (b, 0, 0)),
        compiler_params=pltpu.CompilerParams(
            dimension_semantics=("parallel",),
            vmem_limit_bytes=vmem_limit,
        ),
    )(x2, P, masks)
    if HWp != HW:
        out = out[:, :, :HW]
    return out.reshape(B, C, H, W)


def convscatt_ref(x, params, kernel_size):
    # Pure-JAX reference (NCHW), mirrors the PyTorch forward pass (same GELU form).
    k = kernel_size
    B, C, H, W = x.shape
    p = k // 2

    def cacm(t):
        pool = jnp.mean(t, axis=(2, 3), keepdims=True)               # (B,C,1,1)
        z = jnp.einsum("rc,bcij->brij", params["w_fc1"], pool)
        z = jnp.maximum(z, 0.0)
        s = jnp.einsum("cr,brij->bcij", params["w_fc2"], z)
        return t * jax.nn.sigmoid(s)

    def norm(t):
        u = jnp.mean(t, axis=1, keepdims=True)
        var = jnp.mean((t - u) ** 2, axis=1, keepdims=True)
        tn = (t - u) / jnp.sqrt(var + _LN_EPS)
        return (params["ln_gamma"][None, :, None, None] * tn
                + params["ln_beta"][None, :, None, None])

    def dw1x1(t, w, b):
        return w[None, :, None, None] * t + b[None, :, None, None]

    def dwkxk(t, w, b):
        out = jax.lax.conv_general_dilated(
            t, w.reshape(C, 1, k, k), window_strides=(1, 1),
            padding=[(p, p), (p, p)],
            dimension_numbers=("NCHW", "OIHW", "NCHW"),
            feature_group_count=C)
        return out + b[None, :, None, None]

    x1 = cacm(x)
    y = norm(x1)
    a = _gelu_tanh(dw1x1(y, params["w_att1"], params["b_att1"]))
    a = dwkxk(a, params["w_att2"], params["b_att2"])
    v = dw1x1(y, params["w_v"], params["b_v"])
    y2 = a * v
    y3 = cacm(y2)
    y4 = dw1x1(y3, params["w_proj"], params["b_proj"])
    return x1 + y4


if __name__ == "__main__":
    B, C, H, W = 2, 32, 16, 16     # dim=32 so dim//reduction(=16) = 2
    kernel_size = 3
    reduction = 16
    Cr = C // reduction

    key = jax.random.PRNGKey(0)
    keys = jax.random.split(key, 12)
    x = jax.random.normal(keys[0], (B, C, H, W), dtype=jnp.float32)

    params = {
        # CACM: fc1 Conv2d(C, C//16, 1, bias=False), fc2 Conv2d(C//16, C, 1, bias=False)
        "w_fc1": 0.2 * jax.random.normal(keys[1], (Cr, C), jnp.float32),
        "w_fc2": 0.2 * jax.random.normal(keys[2], (C, Cr), jnp.float32),
        # LayerNorm (channels_first), default init ones / zeros
        "ln_gamma": jnp.ones((C,), jnp.float32),
        "ln_beta": jnp.zeros((C,), jnp.float32),
        # att[0]: depthwise 1x1 conv (weight (C,1,1,1) -> (C,), bias (C,))
        "w_att1": 0.5 + 0.1 * jax.random.normal(keys[3], (C,), jnp.float32),
        "b_att1": 0.1 * jax.random.normal(keys[4], (C,), jnp.float32),
        # att[2]: depthwise kxk conv (weight (C,1,k,k) -> (C,k,k), bias (C,))
        "w_att2": 0.2 * jax.random.normal(keys[5], (C, kernel_size, kernel_size),
                                          jnp.float32),
        "b_att2": 0.1 * jax.random.normal(keys[6], (C,), jnp.float32),
        # v: depthwise 1x1 conv
        "w_v": 0.5 + 0.1 * jax.random.normal(keys[7], (C,), jnp.float32),
        "b_v": 0.1 * jax.random.normal(keys[8], (C,), jnp.float32),
        # proj: depthwise 1x1 conv
        "w_proj": 0.5 + 0.1 * jax.random.normal(keys[9], (C,), jnp.float32),
        "b_proj": 0.1 * jax.random.normal(keys[10], (C,), jnp.float32),
    }

    out = convscatt_pallas(x, params, kernel_size)
    out = jax.block_until_ready(out)

    ref = convscatt_ref(x, params, kernel_size)
    np.testing.assert_allclose(np.asarray(out), np.asarray(ref),
                               rtol=1e-3, atol=1e-3)
    print("KERNEL_OK")
</pallas_src>

<mosaic_0001>
module attributes {stable_mosaic.version = 11 : i64} {
  func.func @_convscatt_kernel(%arg0: i32, %arg1: memref<1x32x256xf32, #tpu.memory_space<vmem>>, %arg2: memref<32x22xf32, #tpu.memory_space<vmem>>, %arg3: memref<9x256xf32, #tpu.memory_space<vmem>>, %arg4: memref<1x32x256xf32, #tpu.memory_space<vmem>>) attributes {dimension_semantics = [#tpu.dimension_semantics<parallel>], iteration_bounds = array<i64: 2>, scalar_prefetch = 0 : i64, scratch_operands = 0 : i64, tpu.core_type = #tpu.core_type<tc>, window_params = [{transform_indices = @transform_0, window_bounds = array<i64: 1, 32, 256>}, {pipeline_mode = #tpu.pipeline_mode<synchronous>, transform_indices = @transform_1, window_bounds = array<i64: 32, 22>}, {pipeline_mode = #tpu.pipeline_mode<synchronous>, transform_indices = @transform_2, window_bounds = array<i64: 9, 256>}, {transform_indices = @transform_3, window_bounds = array<i64: 1, 32, 256>}]} {
    %c0 = arith.constant 0 : index
    %c0_0 = arith.constant 0 : index
    %0 = vector.load %arg2[%c0, %c0_0] : memref<32x22xf32, #tpu.memory_space<vmem>>, vector<32x22xf32>
    %1 = vector.extract_strided_slice %0 {offsets = [0, 0], sizes = [32, 9], strides = [1, 1]} : vector<32x22xf32> to vector<32x9xf32>
    %2 = vector.extract_strided_slice %0 {offsets = [0, 9], sizes = [32, 1], strides = [1, 1]} : vector<32x22xf32> to vector<32x1xf32>
    %3 = vector.extract_strided_slice %0 {offsets = [0, 10], sizes = [32, 1], strides = [1, 1]} : vector<32x22xf32> to vector<32x1xf32>
    %4 = vector.extract_strided_slice %0 {offsets = [0, 11], sizes = [32, 1], strides = [1, 1]} : vector<32x22xf32> to vector<32x1xf32>
    %5 = vector.extract_strided_slice %0 {offsets = [0, 12], sizes = [32, 1], strides = [1, 1]} : vector<32x22xf32> to vector<32x1xf32>
    %6 = vector.extract_strided_slice %0 {offsets = [0, 13], sizes = [32, 1], strides = [1, 1]} : vector<32x22xf32> to vector<32x1xf32>
    %7 = vector.extract_strided_slice %0 {offsets = [0, 14], sizes = [32, 1], strides = [1, 1]} : vector<32x22xf32> to vector<32x1xf32>
    %8 = vector.extract_strided_slice %0 {offsets = [0, 15], sizes = [32, 1], strides = [1, 1]} : vector<32x22xf32> to vector<32x1xf32>
    %9 = vector.extract_strided_slice %0 {offsets = [0, 16], sizes = [32, 1], strides = [1, 1]} : vector<32x22xf32> to vector<32x1xf32>
    %10 = vector.extract_strided_slice %0 {offsets = [0, 17], sizes = [32, 1], strides = [1, 1]} : vector<32x22xf32> to vector<32x1xf32>
    %11 = vector.extract_strided_slice %0 {offsets = [0, 18], sizes = [32, 2], strides = [1, 1]} : vector<32x22xf32> to vector<32x2xf32>
    %12 = vector.extract_strided_slice %0 {offsets = [0, 20], sizes = [32, 2], strides = [1, 1]} : vector<32x22xf32> to vector<32x2xf32>
    %c0_1 = arith.constant 0 : index
    %c0_2 = arith.constant 0 : index
    %13 = vector.load %arg3[%c0_1, %c0_2] : memref<9x256xf32, #tpu.memory_space<vmem>>, vector<9x256xf32>
    %c0_3 = arith.constant 0 : index
    %c0_4 = arith.constant 0 : index
    %c0_5 = arith.constant 0 : index
    %14 = vector.load %arg1[%c0_3, %c0_4, %c0_5] : memref<1x32x256xf32, #tpu.memory_space<vmem>>, vector<1x32x256xf32>
    %cst = arith.constant dense<0.000000e+00> : vector<1x32xf32>
    %15 = vector.multi_reduction <add>, %14, %cst [2] : vector<1x32x256xf32> to vector<1x32xf32>
    %cst_6 = arith.constant 3.906250e-03 : f32
    %16 = vector.broadcast %cst_6 : f32 to vector<1x32xf32>
    %17 = arith.mulf %15, %16 : vector<1x32xf32>
    %cst_7 = arith.constant dense<0.000000e+00> : vector<1x2xf32>
    %18 = tpu.matmul %17, %11, %cst_7 {dimension_numbers = #tpu.dot_dimension_numbers<[1], [0], [0], [1], [0, 0, 1, 1], [], []>} : vector<1x32xf32>, vector<32x2xf32>, vector<1x2xf32> -> vector<1x2xf32>
    %cst_8 = arith.constant 0.000000e+00 : f32
    %19 = vector.broadcast %cst_8 : f32 to vector<1x2xf32>
    %20 = arith.maximumf %18, %19 : vector<1x2xf32>
    %cst_9 = arith.constant dense<0.000000e+00> : vector<1x32xf32>
    %21 = tpu.matmul %20, %12, %cst_9 {dimension_numbers = #tpu.dot_dimension_numbers<[1], [1], [0], [0], [0, 0, 1, 0], [], []>} : vector<1x2xf32>, vector<32x2xf32>, vector<1x32xf32> -> vector<1x32xf32>
    %22 = arith.negf %21 : vector<1x32xf32>
    %23 = math.exp %22 : vector<1x32xf32>
    %cst_10 = arith.constant 1.000000e+00 : f32
    %24 = vector.broadcast %cst_10 : f32 to vector<1x32xf32>
    %25 = arith.addf %24, %23 : vector<1x32xf32>
    %26 = arith.divf %24, %25 : vector<1x32xf32>
    %27 = vector.shape_cast %26 : vector<1x32xf32> to vector<1x32x1xf32>
    %28 = vector.broadcast %27 : vector<1x32x1xf32> to vector<1x32x256xf32>
    %29 = arith.mulf %14, %28 : vector<1x32x256xf32>
    %cst_11 = arith.constant dense<0.000000e+00> : vector<1x256xf32>
    %30 = vector.multi_reduction <add>, %29, %cst_11 [1] : vector<1x32x256xf32> to vector<1x256xf32>
    %31 = vector.shape_cast %30 : vector<1x256xf32> to vector<1x1x256xf32>
    %cst_12 = arith.constant 3.125000e-02 : f32
    %32 = vector.broadcast %cst_12 : f32 to vector<1x1x256xf32>
    %33 = arith.mulf %31, %32 : vector<1x1x256xf32>
    %34 = vector.broadcast %33 : vector<1x1x256xf32> to vector<1x32x256xf32>
    %35 = arith.subf %29, %34 : vector<1x32x256xf32>
    %36 = arith.mulf %35, %35 : vector<1x32x256xf32>
    %cst_13 = arith.constant dense<0.000000e+00> : vector<1x256xf32>
    %37 = vector.multi_reduction <add>, %36, %cst_13 [1] : vector<1x32x256xf32> to vector<1x256xf32>
    %38 = vector.shape_cast %37 : vector<1x256xf32> to vector<1x1x256xf32>
    %cst_14 = arith.constant 3.125000e-02 : f32
    %39 = vector.broadcast %cst_14 : f32 to vector<1x1x256xf32>
    %40 = arith.mulf %38, %39 : vector<1x1x256xf32>
    %cst_15 = arith.constant 9.99999997E-7 : f32
    %41 = vector.broadcast %cst_15 : f32 to vector<1x1x256xf32>
    %42 = arith.addf %40, %41 : vector<1x1x256xf32>
    %43 = math.rsqrt %42 : vector<1x1x256xf32>
    %44 = vector.broadcast %43 : vector<1x1x256xf32> to vector<1x32x256xf32>
    %45 = arith.mulf %35, %44 : vector<1x32x256xf32>
    %46 = vector.shape_cast %3 : vector<32x1xf32> to vector<1x32x1xf32>
    %47 = vector.broadcast %46 : vector<1x32x1xf32> to vector<1x32x256xf32>
    %48 = arith.mulf %47, %45 : vector<1x32x256xf32>
    %49 = vector.shape_cast %4 : vector<32x1xf32> to vector<1x32x1xf32>
    %50 = vector.broadcast %49 : vector<1x32x1xf32> to vector<1x32x256xf32>
    %51 = arith.addf %48, %50 : vector<1x32x256xf32>
    %52 = vector.shape_cast %5 : vector<32x1xf32> to vector<1x32x1xf32>
    %53 = vector.broadcast %52 : vector<1x32x1xf32> to vector<1x32x256xf32>
    %54 = arith.mulf %53, %51 : vector<1x32x256xf32>
    %55 = vector.shape_cast %6 : vector<32x1xf32> to vector<1x32x1xf32>
    %56 = vector.broadcast %55 : vector<1x32x1xf32> to vector<1x32x256xf32>
    %57 = arith.addf %54, %56 : vector<1x32x256xf32>
    %cst_16 = arith.constant 5.000000e-01 : f32
    %58 = vector.broadcast %cst_16 : f32 to vector<1x32x256xf32>
    %59 = arith.mulf %58, %57 : vector<1x32x256xf32>
    %cst_17 = arith.constant 4.471500e-02 : f32
    %60 = vector.broadcast %cst_17 : f32 to vector<1x32x256xf32>
    %61 = arith.mulf %60, %57 : vector<1x32x256xf32>
    %62 = arith.mulf %61, %57 : vector<1x32x256xf32>
    %63 = arith.mulf %62, %57 : vector<1x32x256xf32>
    %64 = arith.addf %57, %63 : vector<1x32x256xf32>
    %cst_18 = arith.constant 0.797884583 : f32
    %65 = vector.broadcast %cst_18 : f32 to vector<1x32x256xf32>
    %66 = arith.mulf %65, %64 : vector<1x32x256xf32>
    %67 = math.tanh %66 : vector<1x32x256xf32>
    %cst_19 = arith.constant 1.000000e+00 : f32
    %68 = vector.broadcast %cst_19 : f32 to vector<1x32x256xf32>
    %69 = arith.addf %68, %67 : vector<1x32x256xf32>
    %70 = arith.mulf %59, %69 : vector<1x32x256xf32>
    %71 = vector.extract_strided_slice %1 {offsets = [0, 0], sizes = [32, 1], strides = [1, 1]} : vector<32x9xf32> to vector<32x1xf32>
    %c17_i32 = arith.constant 17 : i32
    %72 = tpu.dynamic_rotate %70 by %c17_i32 dim 2 : vector<1x32x256xf32>, i32 -> vector<1x32x256xf32>
    %73 = vector.extract_strided_slice %13 {offsets = [0, 0], sizes = [1, 256], strides = [1, 1]} : vector<9x256xf32> to vector<1x256xf32>
    %74 = vector.shape_cast %73 : vector<1x256xf32> to vector<1x1x256xf32>
    %75 = vector.broadcast %74 : vector<1x1x256xf32> to vector<1x32x256xf32>
    %76 = arith.mulf %72, %75 : vector<1x32x256xf32>
    %77 = vector.shape_cast %71 : vector<32x1xf32> to vector<1x32x1xf32>
    %78 = vector.broadcast %77 : vector<1x32x1xf32> to vector<1x32x256xf32>
    %79 = arith.mulf %78, %76 : vector<1x32x256xf32>
    %80 = vector.extract_strided_slice %1 {offsets = [0, 1], sizes = [32, 1], strides = [1, 1]} : vector<32x9xf32> to vector<32x1xf32>
    %c16_i32 = arith.constant 16 : i32
    %81 = tpu.dynamic_rotate %70 by %c16_i32 dim 2 : vector<1x32x256xf32>, i32 -> vector<1x32x256xf32>
    %82 = vector.extract_strided_slice %13 {offsets = [1, 0], sizes = [1, 256], strides = [1, 1]} : vector<9x256xf32> to vector<1x256xf32>
    %83 = vector.shape_cast %82 : vector<1x256xf32> to vector<1x1x256xf32>
    %84 = vector.broadcast %83 : vector<1x1x256xf32> to vector<1x32x256xf32>
    %85 = arith.mulf %81, %84 : vector<1x32x256xf32>
    %86 = vector.shape_cast %80 : vector<32x1xf32> to vector<1x32x1xf32>
    %87 = vector.broadcast %86 : vector<1x32x1xf32> to vector<1x32x256xf32>
    %88 = arith.mulf %87, %85 : vector<1x32x256xf32>
    %89 = arith.addf %79, %88 : vector<1x32x256xf32>
    %90 = vector.extract_strided_slice %1 {offsets = [0, 2], sizes = [32, 1], strides = [1, 1]} : vector<32x9xf32> to vector<32x1xf32>
    %c15_i32 = arith.constant 15 : i32
    %91 = tpu.dynamic_rotate %70 by %c15_i32 dim 2 : vector<1x32x256xf32>, i32 -> vector<1x32x256xf32>
    %92 = vector.extract_strided_slice %13 {offsets = [2, 0], sizes = [1, 256], strides = [1, 1]} : vector<9x256xf32> to vector<1x256xf32>
    %93 = vector.shape_cast %92 : vector<1x256xf32> to vector<1x1x256xf32>
    %94 = vector.broadcast %93 : vector<1x1x256xf32> to vector<1x32x256xf32>
    %95 = arith.mulf %91, %94 : vector<1x32x256xf32>
    %96 = vector.shape_cast %90 : vector<32x1xf32> to vector<1x32x1xf32>
    %97 = vector.broadcast %96 : vector<1x32x1xf32> to vector<1x32x256xf32>
    %98 = arith.mulf %97, %95 : vector<1x32x256xf32>
    %99 = arith.addf %89, %98 : vector<1x32x256xf32>
    %100 = vector.extract_strided_slice %1 {offsets = [0, 3], sizes = [32, 1], strides = [1, 1]} : vector<32x9xf32> to vector<32x1xf32>
    %c1_i32 = arith.constant 1 : i32
    %101 = tpu.dynamic_rotate %70 by %c1_i32 dim 2 : vector<1x32x256xf32>, i32 -> vector<1x32x256xf32>
    %102 = vector.extract_strided_slice %13 {offsets = [3, 0], sizes = [1, 256], strides = [1, 1]} : vector<9x256xf32> to vector<1x256xf32>
    %103 = vector.shape_cast %102 : vector<1x256xf32> to vector<1x1x256xf32>
    %104 = vector.broadcast %103 : vector<1x1x256xf32> to vector<1x32x256xf32>
    %105 = arith.mulf %101, %104 : vector<1x32x256xf32>
    %106 = vector.shape_cast %100 : vector<32x1xf32> to vector<1x32x1xf32>
    %107 = vector.broadcast %106 : vector<1x32x1xf32> to vector<1x32x256xf32>
    %108 = arith.mulf %107, %105 : vector<1x32x256xf32>
    %109 = arith.addf %99, %108 : vector<1x32x256xf32>
    %110 = vector.extract_strided_slice %1 {offsets = [0, 4], sizes = [32, 1], strides = [1, 1]} : vector<32x9xf32> to vector<32x1xf32>
    %111 = vector.shape_cast %110 : vector<32x1xf32> to vector<1x32x1xf32>
    %112 = vector.broadcast %111 : vector<1x32x1xf32> to vector<1x32x256xf32>
    %113 = arith.mulf %112, %70 : vector<1x32x256xf32>
    %114 = arith.addf %109, %113 : vector<1x32x256xf32>
    %115 = vector.extract_strided_slice %1 {offsets = [0, 5], sizes = [32, 1], strides = [1, 1]} : vector<32x9xf32> to vector<32x1xf32>
    %c255_i32 = arith.constant 255 : i32
    %116 = tpu.dynamic_rotate %70 by %c255_i32 dim 2 : vector<1x32x256xf32>, i32 -> vector<1x32x256xf32>
    %117 = vector.extract_strided_slice %13 {offsets = [5, 0], sizes = [1, 256], strides = [1, 1]} : vector<9x256xf32> to vector<1x256xf32>
    %118 = vector.shape_cast %117 : vector<1x256xf32> to vector<1x1x256xf32>
    %119 = vector.broadcast %118 : vector<1x1x256xf32> to vector<1x32x256xf32>
    %120 = arith.mulf %116, %119 : vector<1x32x256xf32>
    %121 = vector.shape_cast %115 : vector<32x1xf32> to vector<1x32x1xf32>
    %122 = vector.broadcast %121 : vector<1x32x1xf32> to vector<1x32x256xf32>
    %123 = arith.mulf %122, %120 : vector<1x32x256xf32>
    %124 = arith.addf %114, %123 : vector<1x32x256xf32>
    %125 = vector.extract_strided_slice %1 {offsets = [0, 6], sizes = [32, 1], strides = [1, 1]} : vector<32x9xf32> to vector<32x1xf32>
    %c241_i32 = arith.constant 241 : i32
    %126 = tpu.dynamic_rotate %70 by %c241_i32 dim 2 : vector<1x32x256xf32>, i32 -> vector<1x32x256xf32>
    %127 = vector.extract_strided_slice %13 {offsets = [6, 0], sizes = [1, 256], strides = [1, 1]} : vector<9x256xf32> to vector<1x256xf32>
    %128 = vector.shape_cast %127 : vector<1x256xf32> to vector<1x1x256xf32>
    %129 = vector.broadcast %128 : vector<1x1x256xf32> to vector<1x32x256xf32>
    %130 = arith.mulf %126, %129 : vector<1x32x256xf32>
    %131 = vector.shape_cast %125 : vector<32x1xf32> to vector<1x32x1xf32>
    %132 = vector.broadcast %131 : vector<1x32x1xf32> to vector<1x32x256xf32>
    %133 = arith.mulf %132, %130 : vector<1x32x256xf32>
    %134 = arith.addf %124, %133 : vector<1x32x256xf32>
    %135 = vector.extract_strided_slice %1 {offsets = [0, 7], sizes = [32, 1], strides = [1, 1]} : vector<32x9xf32> to vector<32x1xf32>
    %c240_i32 = arith.constant 240 : i32
    %136 = tpu.dynamic_rotate %70 by %c240_i32 dim 2 : vector<1x32x256xf32>, i32 -> vector<1x32x256xf32>
    %137 = vector.extract_strided_slice %13 {offsets = [7, 0], sizes = [1, 256], strides = [1, 1]} : vector<9x256xf32> to vector<1x256xf32>
    %138 = vector.shape_cast %137 : vector<1x256xf32> to vector<1x1x256xf32>
    %139 = vector.broadcast %138 : vector<1x1x256xf32> to vector<1x32x256xf32>
    %140 = arith.mulf %136, %139 : vector<1x32x256xf32>
    %141 = vector.shape_cast %135 : vector<32x1xf32> to vector<1x32x1xf32>
    %142 = vector.broadcast %141 : vector<1x32x1xf32> to vector<1x32x256xf32>
    %143 = arith.mulf %142, %140 : vector<1x32x256xf32>
    %144 = arith.addf %134, %143 : vector<1x32x256xf32>
    %145 = vector.extract_strided_slice %1 {offsets = [0, 8], sizes = [32, 1], strides = [1, 1]} : vector<32x9xf32> to vector<32x1xf32>
    %c239_i32 = arith.constant 239 : i32
    %146 = tpu.dynamic_rotate %70 by %c239_i32 dim 2 : vector<1x32x256xf32>, i32 -> vector<1x32x256xf32>
    %147 = vector.extract_strided_slice %13 {offsets = [8, 0], sizes = [1, 256], strides = [1, 1]} : vector<9x256xf32> to vector<1x256xf32>
    %148 = vector.shape_cast %147 : vector<1x256xf32> to vector<1x1x256xf32>
    %149 = vector.broadcast %148 : vector<1x1x256xf32> to vector<1x32x256xf32>
    %150 = arith.mulf %146, %149 : vector<1x32x256xf32>
    %151 = vector.shape_cast %145 : vector<32x1xf32> to vector<1x32x1xf32>
    %152 = vector.broadcast %151 : vector<1x32x1xf32> to vector<1x32x256xf32>
    %153 = arith.mulf %152, %150 : vector<1x32x256xf32>
    %154 = arith.addf %144, %153 : vector<1x32x256xf32>
    %155 = vector.shape_cast %2 : vector<32x1xf32> to vector<1x32x1xf32>
    %156 = vector.broadcast %155 : vector<1x32x1xf32> to vector<1x32x256xf32>
    %157 = arith.addf %154, %156 : vector<1x32x256xf32>
    %158 = vector.shape_cast %7 : vector<32x1xf32> to vector<1x32x1xf32>
    %159 = vector.broadcast %158 : vector<1x32x1xf32> to vector<1x32x256xf32>
    %160 = arith.mulf %159, %51 : vector<1x32x256xf32>
    %161 = vector.shape_cast %8 : vector<32x1xf32> to vector<1x32x1xf32>
    %162 = vector.broadcast %161 : vector<1x32x1xf32> to vector<1x32x256xf32>
    %163 = arith.addf %160, %162 : vector<1x32x256xf32>
    %164 = arith.mulf %157, %163 : vector<1x32x256xf32>
    %cst_20 = arith.constant dense<0.000000e+00> : vector<1x32xf32>
    %165 = vector.multi_reduction <add>, %164, %cst_20 [2] : vector<1x32x256xf32> to vector<1x32xf32>
    %cst_21 = arith.constant 3.906250e-03 : f32
    %166 = vector.broadcast %cst_21 : f32 to vector<1x32xf32>
    %167 = arith.mulf %165, %166 : vector<1x32xf32>
    %cst_22 = arith.constant dense<0.000000e+00> : vector<1x2xf32>
    %168 = tpu.matmul %167, %11, %cst_22 {dimension_numbers = #tpu.dot_dimension_numbers<[1], [0], [0], [1], [0, 0, 1, 1], [], []>} : vector<1x32xf32>, vector<32x2xf32>, vector<1x2xf32> -> vector<1x2xf32>
    %cst_23 = arith.constant 0.000000e+00 : f32
    %169 = vector.broadcast %cst_23 : f32 to vector<1x2xf32>
    %170 = arith.maximumf %168, %169 : vector<1x2xf32>
    %cst_24 = arith.constant dense<0.000000e+00> : vector<1x32xf32>
    %171 = tpu.matmul %170, %12, %cst_24 {dimension_numbers = #tpu.dot_dimension_numbers<[1], [1], [0], [0], [0, 0, 1, 0], [], []>} : vector<1x2xf32>, vector<32x2xf32>, vector<1x32xf32> -> vector<1x32xf32>
    %172 = arith.negf %171 : vector<1x32xf32>
    %173 = math.exp %172 : vector<1x32xf32>
    %cst_25 = arith.constant 1.000000e+00 : f32
    %174 = vector.broadcast %cst_25 : f32 to vector<1x32xf32>
    %175 = arith.addf %174, %173 : vector<1x32xf32>
    %176 = arith.divf %174, %175 : vector<1x32xf32>
    %177 = vector.shape_cast %176 : vector<1x32xf32> to vector<1x32x1xf32>
    %178 = vector.broadcast %177 : vector<1x32x1xf32> to vector<1x32x256xf32>
    %179 = arith.mulf %164, %178 : vector<1x32x256xf32>
    %180 = vector.shape_cast %9 : vector<32x1xf32> to vector<1x32x1xf32>
    %181 = vector.broadcast %180 : vector<1x32x1xf32> to vector<1x32x256xf32>
    %182 = arith.mulf %181, %179 : vector<1x32x256xf32>
    %183 = vector.shape_cast %10 : vector<32x1xf32> to vector<1x32x1xf32>
    %184 = vector.broadcast %183 : vector<1x32x1xf32> to vector<1x32x256xf32>
    %185 = arith.addf %182, %184 : vector<1x32x256xf32>
    %186 = arith.addf %29, %185 : vector<1x32x256xf32>
    %c0_26 = arith.constant 0 : index
    %c0_27 = arith.constant 0 : index
    %c0_28 = arith.constant 0 : index
    %187 = vector.load %arg4[%c0_26, %c0_27, %c0_28] : memref<1x32x256xf32, #tpu.memory_space<vmem>>, vector<1x32x256xf32>
    tpu.vector_store %arg4[%c0_26, %c0_27, %c0_28], %186 {strides = array<i32>} : memref<1x32x256xf32, #tpu.memory_space<vmem>>, vector<1x32x256xf32>,
    return
  }
  func.func @transform_0(%arg0: i32) -> (i32, i32, i32) {
    %c0_i32 = arith.constant 0 : i32
    %c0_i32_0 = arith.constant 0 : i32
    %c0_i32_1 = arith.constant 0 : i32
    return %arg0, %c0_i32, %c0_i32_0 : i32, i32, i32
  }
  func.func @transform_1(%arg0: i32) -> (i32, i32) {
    %c0_i32 = arith.constant 0 : i32
    %c0_i32_0 = arith.constant 0 : i32
    %c0_i32_1 = arith.constant 0 : i32
    return %c0_i32, %c0_i32_0 : i32, i32
  }
  func.func @transform_2(%arg0: i32) -> (i32, i32) {
    %c0_i32 = arith.constant 0 : i32
    %c0_i32_0 = arith.constant 0 : i32
    %c0_i32_1 = arith.constant 0 : i32
    return %c0_i32, %c0_i32_0 : i32, i32
  }
  func.func @transform_3(%arg0: i32) -> (i32, i32, i32) {
    %c0_i32 = arith.constant 0 : i32
    %c0_i32_0 = arith.constant 0 : i32
    %c0_i32_1 = arith.constant 0 : i32
    return %arg0, %c0_i32, %c0_i32_0 : i32, i32, i32
  }
}

</mosaic_0001>

<bundles_post_ra>
// kernel: tpu_custom_call.1
= control target key start
LH: loop header
LB: loop body
LE: loop exit
PB: predicated region body
PF: predicated region fallthrough
CT: control target
= control target key end

     0   :  { %8 = vsyncpa [#allocation3], 0  ;;  %s3083_s0 = inlined_call_operand.hbm [shape: f32[2,32,256], index: 0, kind: input, shape index: {}]   ;;  %s3084_s1 = inlined_call_operand.vmem [shape: f32[32,22], index: 1, kind: input, shape index: {}]   ;;  %s3085_s2 = inlined_call_operand.vmem [shape: f32[9,256], index: 2, kind: input, shape index: {}]   ;;  %s3086_s3 = inlined_call_operand.hbm [shape: f32[2,32,256], index: 3, kind: output, shape index: {}]  }
   0x1   :  { %10 = vsyncpa [#allocation3 + $0x1], 0 }
   0x2   :  { %11 = vsyncpa [#allocation4], 0 }
   0x3   :  { %13 = vsyncpa [#allocation4 + $0x1], 0  ;;  %s1908_s12 = smov 0   ;;  %s1910_s13 = smov 0  }
   0x4   :  { %s1912_s14 = smov 0   ;;  %s1914_s15 = smov 0  }
   0x5 LB: > { %s1929_s16 = sadd.s32 4294967295, %s1855_s15   ;;  %s1546_s17 = sadd.s32 4294967294, %s1855_s15   ;;  %s1855_s15 = sphi %s1914_s15, %s3231_s15   ;;  %s1851_s14 = sphi %s1912_s14, %s3230_s14   ;;  %s1847_s13 = sphi %s1910_s13, %s3229_s13   ;;  %s1843_s12 = sphi %s1908_s12, %s3228_s12  }
   0x6   : > { %s1933_s18 = sadd.s32 1, %s1855_s15   ;;  %s26_s19 = sadd.s32 1, %s1851_s14 }
   0x7   : > { %s23_s20 = ssub.s32 %s1855_s15, %s1933_s18  ;;  %p33_p0 = scmp.ne.s32.totalorder %s1851_s14, %s1847_s13 }
   0x8   : > { %p24_p1 = scmp.eq.s32.totalorder %s23_s20, 0  ;;  %p34_p2 = scmp.eq.s32.totalorder %s1855_s15, 0 }
   0x9   : > { %p39_p3 = scmp.ne.s32.totalorder %s1847_s13, %s1843_s12  ;;  %p40_p4 = scmp.eq.s32.totalorder %s1929_s16, 0 }
   0xa   : > { %s1945_s21 = scalar_select %p24_p1, %s1851_s14, %s26_s19  }
   0xb   : > { %p1947_p5 = por %p34_p2, %p33_p0  ;;  %p1951_p6 = por %p40_p4, %p39_p3 }
   0xc   : > { %p105_p7 = scmp.eq.s32.totalorder %s1929_s16, 1  ;;  %p111_p8 = scmp.eq.s32.totalorder %s1546_s17, 1 }
   0xd   : > { %p1588_p10 = scmp.lt.s32.totalorder %s1855_s15, 2  ;;  %s137_s26 = sand.u32 1, %s1851_s14  }
   0xe   : > { %p1958_p11 = por %p105_p7, %p33_p0  ;;  %p1962_p12 = por %p111_p8, %p39_p3 }
   0xf   : > { %s1574_s27 = sshll.u32 %s1855_s15, 6  ;;  %s1549_s28 = sshll.u32 %s137_s26, 6 }
  0x10   : > { %s146_s4 = scalar_lea.hbm %s3083_s0, %s1574_s27  ;;  %s141_s6 = scalar_lea.vmem [#allocation2], %s1549_s28 }
  0x11   : > { %s147_s5 = sshll.u32 %s146_s4, 4  ;;  %s149_s7 = sshll.u32 %s141_s6, 4  ;;  %s148_s5 = int_to_ptr.hbm [resolvable:$true] %s147_s5  ;;  %s150_s7 = int_to_ptr.vmem [resolvable:$true] %s149_s7 }
  0x12   : > { %p1973_p13 = pnand %p1588_p10, %p1947_p5  ;;  %p1552_p0 = scmp.ge.s32.totalorder %s1855_s15, 1 }
  0x13   : > { %p157_p1 = scmp.lt.s32.totalorder %s1855_s15, 3  ;;  %s138_s9 = scalar_lea.sflag [#allocation3], %s137_s26 }
  0x14   : > { %s1759_s10 = sshra.s32 %s148_s5, 4  ;;  %p1763_p3 = pneg %p1973_p13  ;;  %s1760_s10 = int_to_ptr.hbm [resolvable:$true] %s1759_s10 }
  0x15   : > { %s1761_s11 = scalar_lea.hbm %s1760_s10, 64  ;;  %s1766_s20 = scalar_lea.hbm %s3083_s0, 128 }
  0x16   : > { %p1762_p2 = scmp.ne.s32.totalorder %s1760_s10, %s1761_s11  ;;  %p1767_p5 = scmp.lt.s32.totalorder %s1760_s10, %s3083_s0 }
  0x17   : > { %p1768_p8 = scmp.lt.s32.totalorder %s1766_s20, %s1761_s11 }
  0x18   : > { %p1764_p4 = pnand %p1763_p3, %p1762_p2 }
  0x19   : > { %p1769_p10 = por %p1768_p8, %p1767_p5 }
  0x1a   : > { %p1765_p7 = pneg %p1764_p4 }
  0x1c   : > { %p1770_p9 = pnand %p1769_p10, %p1765_p7 }
  0x1e   : > { %1773 = shalt.err (!%p1770_p9)
}
  0x1f   : > { %s1857_s26 = smov 256   ;;  %s1858_s28 = smov 16  }
  0x20   : > { %1583 = dma.hbm_to_vmem [thread:$0]  (!%p1973_p13), %s148_s5, 1024, %s150_s7, %s138_s9, %s1857_s26, %s1857_s26, %s1858_s28  }
  0x21   : > { %p158_p2 = pnand %p1552_p0, %p157_p1 }
  0x23   : > { %161 = sbr.rel (%p158_p2) target bundleno = 1560 (0x618), region = 32 }
  0x28   : > { %s1994_s29 = sand.u32 1, %s1847_s13  }
  0x29   : > { %s1553_s30 = sshll.u32 %s1994_s29, 6  ;;  %s164_s4 = scalar_lea.sflag [#allocation3], %s1994_s29 }
  0x2a   : > { %s167_s6 = scalar_lea.vmem [#allocation2], %s1553_s30 }
  0x2b   : > { %1834 = dma.done.wait (%p1951_p6), %s164_s4, 1024  }
  0x2c   : > { %1836 = vsyncadd (%p1951_p6), %s164_s4, 4294966272  ;;  %v2004_v0 = vld [vmem:[%s167_s6 + $0x20] sm:$0xff]  ;;  %v2006_v1 = vld [vmem:[%s167_s6 + $0x28] sm:$0xff]  ;;  %s1859_s19 = smov 110   ;;  %s1860_s20 = smov 108   ;;  %v1861_v18 = vmov 10   ;;  %v227_v21 = vlaneseq }
  0x2d   : > { %v2008_v2 = vld [vmem:[%s167_s6] sm:$0xff]  ;;  %v213_v3 = vadd.f32 %v2006_v1, %v2004_v0  ;;  %v2012_v4 = vld [vmem:[%s167_s6 + $0x8] sm:$0xff]  ;;  %v2016_v6 = vld [vmem:[%s167_s6 + $0x30] sm:$0xff]  ;;  %1663 = vset.pattern.permute.xlu1 %v1861_v18  ;;  %1664 = vset.pattern.permute.xlu2 %v1861_v18  ;;  %v1862_v20 = vmov 11   ;;  %v1863_v22 = vmov 12   ;;  %v1864_v33 = vmov 13  }
  0x2e   : > { %v207_v5 = vadd.f32 %v2012_v4, %v2008_v2  ;;  %v2018_v7 = vld [vmem:[%s167_s6 + $0x38] sm:$0xff]  ;;  %v2022_v9 = vld [vmem:[%s167_s6 + $0x10] sm:$0xff]  ;;  %v2041_v14 = vld [vmem:[%s3084_s1] sm:$0xff]  ;;  %1665 = vset.pattern.permute.xlu0 %v1861_v18  ;;  %v2063_v26 = vand.u32 127, %v227_v21  ;;  %vm232_vm0 = vcmask 130112   ;;  %vm236_vm1 = vcmask 195712  }
  0x2f   : > { %214 = vadd.xlane.f32.xlu1 %v213_v3  ;;  %v216_v8 = vadd.f32 %v2018_v7, %v2016_v6  ;;  %v2024_v10 = vld [vmem:[%s167_s6 + $0x18] sm:$0xff]  ;;  %v2031_v12 = vld [vmem:[%s3084_s1 + $0x10] sm:$0xff]  ;;  %v2046_v15 = vld [vmem:[%s3084_s1 + $0x8] sm:$0xff]  ;;  %vm290_vm2 = vcmask 15360   ;;  %vm240_vm3 = vcmask 261312   ;;  %vm258_vm4 = vcmask 261120  }
  0x30   : > { %208 = vadd.xlane.f32.xlu0 %v207_v5  ;;  %v210_v11 = vadd.f32 %v2024_v10, %v2022_v9  ;;  %v2036_v13 = vld [vmem:[%s3084_s1 + $0x18] sm:$0xff]  ;;  %v1658_v17 = vpack.i.bf16 %v2041_v14, %v2046_v15  ;;  %v2066_v28 = vadd.s32 4294967288, %v2063_v26  ;;  %v2073_v34 = vadd.s32 4294967280, %v2063_v26  ;;  %s1877_s22 = smov 17   ;;  %s1878_s27 = smov 16  }
  0x31   : > { %217 = vadd.xlane.f32.xlu2 %v216_v8  ;;  %v1653_v16 = vpack.i.bf16 %v2031_v12, %v2036_v13  ;;  %v2077_v37 = vadd.s32 4294967272, %v2063_v26  ;;  %v1865_v51 = vmov 0   ;;  %v1866_v53 = vmov 1   ;;  %s1879_s26 = smov 15   ;;  %s1880_s28 = smov 1  }
  0x32   : > { %3137 = vst [vmem:[#allocation8_spill] sm:$0xff] %v2066_v28  ;;  %v1867_v54 = vmov 2   ;;  %v1868_v55 = vmov 3   ;;  %v1869_v58 = vmov 4   ;;  %v1870_v59 = vmov 5   ;;  %s1881_s4 = smov 127  }
  0x33   : > { %3138 = vst [vmem:[#allocation9_spill] sm:$0xff] %v2073_v34  ;;  %v1871_v60 = vmov 6   ;;  %v1872_v61 = vmov 7   ;;  %v1873_v63 = vmov 8   ;;  %v1874_v5 = vmov 14   ;;  %s1882_s6 = smov 113  }
  0x34   : > { %3139 = vst [vmem:[#allocation10_spill] sm:$0xff] %v2077_v37  ;;  %s1883_s23 = smov 112   ;;  %vm644_vm15 = vcmp.lt.s32.totalorder %v2063_v26, 17  ;;  %s1884_s5 = smov 111  }
  0x35   : > { %s3028_s8 = scalar_lea.vmem [#allocation5], %s1553_s30  ;;  %s1575_s30 = sshll.u32 %s1929_s16, 6 }
  0x36   : > { %s1469_s11 = scalar_lea.hbm %s3086_s3, %s1575_s30  ;;  %s1470_s17 = sshll.u32 %s3028_s8, 4  ;;  %s1471_s17 = int_to_ptr.vmem [resolvable:$true] %s1470_s17 }
  0x37   : > { %s1472_s16 = sshll.u32 %s1469_s11, 4  ;;  %s1473_s16 = int_to_ptr.hbm [resolvable:$true] %s1472_s16 }
  0x38   : > { %211 = vadd.xlane.f32.xlu0 %v210_v11 }
  0x48   : > { %1654 = vrot.lane.b32.xlu1 %v1653_v16, %s1859_s19 }
  0x49   : > { %1659 = vrot.lane.b32.xlu2 %v1658_v17, %s1859_s19  ;;  %s1458_s19 = scalar_lea.sflag [#allocation4], %s1994_s29 }
  0x4c   : > { %288 = vrot.lane.b32.xlu0 %v2036_v13, %s1860_s20 }
  0x50   : > { %284 = vrot.lane.b32.xlu1 %v2046_v15, %s1860_s20 }
  0x51   : > { %286 = vrot.lane.b32.xlu2 %v2031_v12, %s1860_s20 }
  0x54   : > { %282 = vrot.lane.b32.xlu0 %v2041_v14, %s1860_s20  ;;  %s1803_s20 = sshra.s32 %s1473_s16, 4  ;;  %s1804_s20 = int_to_ptr.hbm [resolvable:$true] %s1803_s20 }
  0x55   : > { %p1810_p0 = scmp.lt.s32.totalorder %s1804_s20, %s3086_s3 }
  0x58   : > { %461 = vperm.xlu1 %1663, %v2041_v14  }
  0x59   : > { %465 = vperm.xlu2 %1664, %v2046_v15  }
  0x5c   : > { %473 = vperm.xlu0 %1665, %v2036_v13  }
  0x60   : > { %469 = vperm.xlu1 %1663, %v2031_v12  }
  0x61   : > { %1666 = vset.pattern.permute.xlu2 %v1862_v20 }
  0x62   : > { %485 = vperm.xlu2 %1666, %v2041_v14  }
  0x64   : > { %1668 = vset.pattern.permute.xlu0 %v1863_v22 }
  0x65   : > { %509 = vperm.xlu0 %1668, %v2041_v14  }
  0x68   : > { %1667 = vset.pattern.permute.xlu1 %v1862_v20 }
  0x69   : > { %489 = vperm.xlu1 %1667, %v2046_v15  }
  0x6a   : > { %493 = vperm.xlu2 %1666, %v2031_v12  }
  0x6d   : > { %1672 = vset.pattern.permute.xlu0 %v1864_v33 }
  0x6e   : > { %537 = vperm.xlu0 %1672, %v2046_v15  }
  0x71   : > { %497 = vperm.xlu1 %1667, %v2036_v13  }
  0x72   : > { %1669 = vset.pattern.permute.xlu2 %v1863_v22 }
  0x73   : > { %513 = vperm.xlu2 %1669, %v2046_v15  }
  0x76   : > { %1674 = vset.pattern.permute.xlu0 %v1865_v51 }
  0x77   : > { %664 = vperm.xlu0 %1674, %v2041_v14  }
  0x79   : > { %1670 = vset.pattern.permute.xlu1 %v1863_v22 }
  0x7a   : > { %517 = vperm.xlu1 %1670, %v2031_v12  }
  0x7b   : > { %521 = vperm.xlu2 %1669, %v2036_v13  }
  0x7f   : > { %1679 = vset.pattern.permute.xlu0 %v1866_v53 }
  0x80   : > { %731 = vperm.xlu0 %1679, %v2031_v12  }
  0x82   : > { %1671 = vset.pattern.permute.xlu1 %v1864_v33 }
  0x83   : > { %533 = vperm.xlu1 %1671, %v2041_v14   ;;  %1673 = vset.pattern.permute.xlu2 %v1864_v33 }
  0x84   : > { %541 = vperm.xlu2 %1673, %v2031_v12  }
  0x88   : > { %1680 = vset.pattern.permute.xlu0 %v1867_v54 }
  0x89   : > { %790 = vperm.xlu0 %1680, %v2041_v14  }
  0x8b   : > { %545 = vperm.xlu1 %1671, %v2036_v13  }
  0x8c   : > { %1675 = vset.pattern.permute.xlu2 %v1865_v51 }
  0x8d   : > { %668 = vperm.xlu2 %1675, %v2046_v15  }
  0x91   : > { %1683 = vset.pattern.permute.xlu0 %v1868_v55 }
  0x92   : > { %857 = vperm.xlu0 %1683, %v2041_v14  }
  0x93   : > { %1676 = vset.pattern.permute.xlu1 %v1865_v51 }
  0x94   : > { %672 = vperm.xlu1 %1676, %v2031_v12  }
  0x95   : > { %676 = vperm.xlu2 %1675, %v2036_v13  }
  0x9a   : > { %1686 = vset.pattern.permute.xlu0 %v1869_v58 }
  0x9b   : > { %889 = vperm.xlu0 %1686, %v2041_v14  }
  0x9c   : > { %1678 = vset.pattern.permute.xlu1 %v1866_v53 }
  0x9d   : > { %1677 = vset.pattern.permute.xlu2 %v1866_v53  ;;  %727 = vperm.xlu1 %1678, %v2046_v15  }
  0x9e   : > { %723 = vperm.xlu2 %1677, %v2041_v14  }
  0xa2   : > { %v215_v24 = vpop.xlane.xlu1 %214 }
  0xa3   : > { %v209_v19 = vpop.xlane.xlu0 %208  ;;  %v221_v35 = vmul.f32 0.00390625, %v215_v24  ;;  %901 = vperm.xlu0 %1686, %v2036_v13   ;;  %v1875_v24 = vmov 9  }
  0xa4   : > { %v218_v23 = vpop.xlane.xlu2 %217  ;;  %v219_v27 = vmul.f32 0.00390625, %v209_v19 }
  0xa5   : > { %v222_v38 = vmul.f32 0.00390625, %v218_v23  ;;  %v235_v43 = vperm.slane %v221_v35, %v2073_v34  ;;  %1682 = vset.pattern.permute.xlu1 %v1867_v54 }
  0xa6   : > { %v229_v30 = vperm.slane %v219_v27, %v2063_v26  ;;  %735 = vperm.xlu2 %1677, %v2036_v13   ;;  %798 = vperm.xlu1 %1682, %v2031_v12  }
  0xa7   : > { %v239_v45 = vperm.slane %v222_v38, %v2077_v37 }
  0xab   : > { %v212_v25 = vpop.xlane.xlu0 %211  ;;  %1691 = vset.pattern.permute.xlu0 %v1870_v59 }
  0xac   : > { %v220_v29 = vmul.f32 0.00390625, %v212_v25  ;;  %v1660_v32 = vpop.permute.xlu2 %1659  ;;  %968 = vperm.xlu0 %1691, %v2036_v13  }
  0xad   : > { %v1661_v41 = vunpack.i.l.bf16 %v1660_v32  ;;  %v1662_v47 = vunpack.i.h.bf16 %v1660_v32 }
  0xae   : > { %v231_v31 = vperm.slane %v220_v29, %v2066_v28  ;;  %1681 = vset.pattern.permute.xlu2 %v1867_v54  ;;  %802 = vperm.xlu1 %1682, %v2036_v13  }
  0xaf   : > { %794 = vperm.xlu2 %1681, %v2046_v15  }
  0xb0   : > { %v233_v42 = vsel %vm232_vm0, %v231_v31, %v229_v30  ;;  %v2172_v30 = vshrl.u32 %v227_v21, 7 }
  0xb1   : > { %v237_v46 = vsel %vm236_vm1, %v235_v43, %v233_v42 }
  0xb2   : > { %v241_v49 = vsel %vm240_vm3, %v239_v45, %v237_v46  ;;  %3140 = vst [vmem:[#allocation11_spill] sm:$0xff] %v2172_v30  ;;  %v2175_v31 = vadd.s32 8, %v2172_v30  ;;  %v2178_v32 = vadd.s32 16, %v2172_v30 }
  0xb4   : > { %v287_v48 = vpop.permute.xlu2 %286  ;;  %1694 = vset.pattern.permute.xlu0 %v1871_v60  ;;  %3141 = vst [vmem:[#allocation12_spill] sm:$0xff] %v2178_v32 }
  0xb5   : > { %1031 = vperm.xlu0 %1694, %v2031_v12  }
  0xb6   : > { %1685 = vset.pattern.permute.xlu1 %v1868_v55 }
  0xb7   : > { %1684 = vset.pattern.permute.xlu2 %v1868_v55  ;;  %865 = vperm.xlu1 %1685, %v2031_v12  }
  0xb8   : > { %861 = vperm.xlu2 %1684, %v2046_v15  }
  0xba   : > { %v1655_v36 = vpop.permute.xlu1 %1654 }
  0xbb   : > { %v1656_v39 = vunpack.i.l.bf16 %v1655_v36  ;;  %v1657_v40 = vunpack.i.h.bf16 %v1655_v36 }
  0xbc   : > { %v2143_v11 = vpop.permute.xlu2 %465 }
  0xbd   : > { %273 = vmatpush.msra.mxu0 %v1656_v39  ;;  %1309 = vmatpush.msra.mxu2 %v1656_v39 }
  0xbe   : > { %v289_v44 = vpop.permute.xlu0 %288  ;;  %1695 = vset.pattern.permute.xlu0 %v1872_v61 }
  0xbf   : > { %274 = vmatpush.msra.mxu0 %v1657_v40  ;;  %1310 = vmatpush.msra.mxu2 %v1657_v40 }
  0xc0   : > { %1556 = vmatpush.xpose.msk.msra.mxu1 %vm290_vm2, %v289_v44  ;;  %1563 = vmatpush.xpose.msk.msra.mxu3 %vm290_vm2, %v289_v44 }
  0xc1   : > { %275 = vmatpush.msra.mxu0 %v1661_v41  ;;  %1311 = vmatpush.msra.mxu2 %v1661_v41 }
  0xc2   : > { %v285_v50 = vpop.permute.xlu1 %284  ;;  %869 = vperm.xlu1 %1685, %v2036_v13   ;;  %1687 = vset.pattern.permute.xlu2 %v1869_v58 }
  0xc3   : > { %276 = vmatpush.msra.mxu0 %v1662_v47  ;;  %1312 = vmatpush.msra.mxu2 %v1662_v47 }
  0xc4   : > { %1555 = vmatmul.msk.f32.vlgmr.msra.gmra.mxu0 %vm258_vm4, %v241_v49  ;;  %1557 = vmatpush.xpose.msk.msra.mxu1 %vm290_vm2, %v287_v48  ;;  %v2149_v17 = vpop.permute.xlu2 %485 }
  0xc5   : > { %1564 = vmatpush.xpose.msk.msra.mxu3 %vm290_vm2, %v287_v48  ;;  %893 = vperm.xlu2 %1687, %v2046_v15  }
  0xc6   : > { %v283_v52 = vpop.permute.xlu0 %282  ;;  %1090 = vperm.xlu0 %1695, %v2041_v14  }
  0xc8   : > { %1558 = vmatpush.xpose.msk.msra.mxu1 %vm290_vm2, %v285_v50 }
  0xc9   : > { %1565 = vmatpush.xpose.msk.msra.mxu3 %vm290_vm2, %v285_v50 }
  0xca   : > { %1688 = vset.pattern.permute.xlu1 %v1869_v58  ;;  %v2130_v62 = vpop.permute.xlu1 %461 }
  0xcb   : > { %897 = vperm.xlu1 %1688, %v2031_v12  }
  0xcc   : > { %1559 = vmatpush.xpose.msk.msra.mxu1 %vm290_vm2, %v283_v52  ;;  %v2154_v19 = vpop.permute.xlu2 %493 }
  0xcd   : > { %1566 = vmatpush.xpose.msk.msra.mxu3 %vm290_vm2, %v283_v52  ;;  %1689 = vset.pattern.permute.xlu2 %v1870_v59 }
  0xce   : > { %956 = vperm.xlu2 %1689, %v2041_v14   ;;  %1698 = vset.pattern.permute.xlu0 %v1873_v63  ;;  %v2191_v40 = vpop.permute.xlu0 %473 }
  0xcf   : > { %1157 = vperm.xlu0 %1698, %v2041_v14  }
  0xd2   : > { %v2136_v3 = vpop.permute.xlu1 %469 }
  0xd3   : > { %1690 = vset.pattern.permute.xlu1 %v1870_v59 }
  0xd4   : > { %960 = vperm.xlu1 %1690, %v2046_v15   ;;  %v2158_v22 = vpop.permute.xlu2 %513 }
  0xd6   : > { %1692 = vset.pattern.permute.xlu2 %v1871_v60 }
  0xd7   : > { %1023 = vperm.xlu2 %1692, %v2041_v14   ;;  %1702 = vset.pattern.permute.xlu0 %v1874_v5  ;;  %v2197_v46 = vpop.permute.xlu0 %509 }
  0xd8   : > { %1217 = vperm.xlu0 %1702, %v2046_v15  }
  0xdb   : > { %v2141_v8 = vpop.permute.xlu1 %489 }
  0xdc   : > { %964 = vperm.xlu1 %1690, %v2031_v12   ;;  %v2164_v25 = vpop.permute.xlu2 %521 }
  0xdf   : > { %1696 = vset.pattern.permute.xlu2 %v1872_v61 }
  0xe0   : > { %1094 = vperm.xlu2 %1696, %v2046_v15   ;;  %1709 = vset.pattern.permute.xlu0 %v2178_v32 }
  0xe3   : > { %v2146_v16 = vpop.permute.xlu1 %497 }
  0xe4   : > { %1693 = vset.pattern.permute.xlu1 %v1871_v60  ;;  %v2169_v29 = vpop.permute.xlu2 %541 }
  0xe5   : > { %1027 = vperm.xlu1 %1693, %v2046_v15  }
  0xe8   : > { %1699 = vset.pattern.permute.xlu2 %v1873_v63 }
  0xe9   : > { %1161 = vperm.xlu2 %1699, %v2046_v15  }
  0xec   : > { %v2151_v18 = vpop.permute.xlu1 %517 }
  0xed   : > { %1035 = vperm.xlu1 %1693, %v2036_v13  }
  0xf1   : > { %1169 = vperm.xlu2 %1699, %v2036_v13  }
  0xf5   : > { %1697 = vset.pattern.permute.xlu1 %v1872_v61  ;;  %v2156_v20 = vpop.permute.xlu1 %533 }
  0xf6   : > { %1098 = vperm.xlu1 %1697, %v2031_v12  }
  0xf9   : > { %1703 = vset.pattern.permute.xlu2 %v1874_v5 }
  0xfa   : > { %1221 = vperm.xlu2 %1703, %v2031_v12  }
  0xfd   : > { %v2160_v23 = vpop.permute.xlu1 %545 }
  0xfe   : > { %1102 = vperm.xlu1 %1697, %v2036_v13  }
 0x102   : > { %1705 = vset.pattern.permute.xlu2 %v1875_v24 }
 0x103   : > { %1193 = vperm.xlu2 %1705, %v2046_v15  }
 0x106   : > { %1700 = vset.pattern.permute.xlu1 %v1873_v63  ;;  %v2166_v27 = vpop.permute.xlu1 %672 }
 0x107   : > { %1165 = vperm.xlu1 %1700, %v2031_v12  }
 0x10b   : > { %1707 = vset.pattern.permute.xlu2 %v2172_v30 }
 0x10f   : > { %1701 = vset.pattern.permute.xlu1 %v1874_v5  ;;  %v2181_v33 = vpop.permute.xlu1 %727 }
 0x110   : > { %1213 = vperm.xlu1 %1701, %v2041_v14  }
 0x118   : > { %1704 = vset.pattern.permute.xlu1 %v1875_v24  ;;  %v2187_v36 = vpop.permute.xlu1 %798 }
 0x119   : > { %1189 = vperm.xlu1 %1704, %v2041_v14  }
 0x120   : > { %v2193_v42 = vpop.permute.xlu1 %802 }
 0x121   : > { %1706 = vset.pattern.permute.xlu1 %v1874_v5  ;;  %v1876_v5 = vmov 15  }
 0x122   : > { %1225 = vperm.xlu1 %1706, %v2036_v13   ;;  %v2185_v13 = vpop.permute.xlu2 %668 }
 0x129   : > { %v2199_v48 = vpop.permute.xlu1 %865 }
 0x12a   : > { %1708 = vset.pattern.permute.xlu1 %v2175_v31  ;;  %v2189_v38 = vpop.permute.xlu2 %676  ;;  %3142 = vst [vmem:[#allocation13_spill] sm:$0xff] %v2199_v48 }
 0x132   : > { %v2195_v43 = vpop.permute.xlu2 %723 }
 0x134   : > { %v2205_v59 = vpop.permute.xlu1 %869 }
 0x135   : > { %3143 = vst [vmem:[#allocation14_spill] sm:$0xff] %v2205_v59 }
 0x13a   : > { %v2201_v54 = vpop.permute.xlu2 %735 }
 0x13d   : > { %v2209_v61 = vpop.permute.xlu1 %897 }
 0x13e   : > { %3144 = vst [vmem:[#allocation15_spill] sm:$0xff] %v2209_v61 }
 0x141   : > { %v278_v56 = vpop.f32.mrf.mxu0 }
 0x142   : > { %v281_v57 = vmax.f32 %v278_v56, 0.0  ;;  %v2207_v60 = vpop.permute.xlu2 %794 }
 0x144   : > { %1560 = vmatmul.msk.f32.vlgmr.msra.gmra.mxu1 %vm290_vm2, %v281_v57  ;;  %v2203_v57 = vpop.permute.xlu0 %537 }
 0x14c   : > { %v2211_v63 = vpop.permute.xlu0 %664 }
 0x1c1   : > { %v319_v35 = vpop.f32.mrf.mxu1 }
 0x1c2   : > { %v1561_v21 = vmul.f32 -1.442695, %v319_v35  ;;  %v2216_v35 = vpop.permute.xlu2 %861 }
 0x1c3   : > { %3145 = vst [vmem:[#allocation16_spill] sm:$0xff] %v2216_v35 }
 0x1c4   : > { %1727 = vpow2.f32 %v1561_v21  ;;  %v2219_v21 = vadd.s32 24, %v2172_v30 }
 0x1c6   : > { %3146 = vst [vmem:[#allocation17_spill] sm:$0xff] %v2219_v21 }
 0x1ca   : > { %v1728_v39 = vpop.eup %1727 }
 0x1cb   : > { %v325_v41 = vadd.f32 1.0, %v1728_v39  ;;  %v2221_v39 = vpop.permute.xlu1 %960 }
 0x1cc   : > { %3147 = vst [vmem:[#allocation18_spill] sm:$0xff] %v2221_v39 }
 0x1cd   : > { %1729 = vrcp.f32 %v325_v41  ;;  %v337_v49 = vand.u32 2147483648, %v325_v41  ;;  %v335_v51 = vand.u32 2147483647, %v325_v41  ;;  %vm331_vm6 = vweird.f32 %v325_v41 }
 0x1cf   : > { %v338_v53 = vor.u32 1.1754944e-38, %v337_v49  ;;  %vm336_vm8 = vcmp.eq.f32.partialorder %v335_v51, 8.507059e+37 }
 0x1d3   : > { %v1730_v44 = vpop.eup %1729 }
 0x1d4   : > { %v327_v45 = vmul.f32 %v1730_v44, %v325_v41  ;;  %vm332_vm5 = vweird.f32 %v1730_v44  ;;  %v2223_v41 = vpop.permute.xlu0 %731 }
 0x1d5   : > { %vm333_vm7 = vmor %vm331_vm6, %vm332_vm5  ;;  %vm703_vm5 = vcmp.lt.s32.totalorder %v2063_v26, 16  ;;  %vm770_vm6 = vcmp.lt.s32.totalorder %v2063_v26, 15 }
 0x1d6   : > { %v328_v47 = vsub.f32 1.0, %v327_v45 }
 0x1d8   : > { %v329_v50 = vmul.f32 %v1730_v44, %v328_v47 }
 0x1da   : > { %v330_v52 = vadd.f32 %v1730_v44, %v329_v50 }
 0x1dc   : > { %v334_v55 = vsel %vm333_vm7, %v1730_v44, %v330_v52  ;;  %v2226_v44 = vpop.permute.xlu2 %893  ;;  %vm837_vm7 = vcmp.lt.s32.totalorder %v2063_v26, 1 }
 0x1dd   : > { %v339_v56 = vsel %vm336_vm8, %v338_v53, %v334_v55  ;;  %3148 = vst [vmem:[#allocation19_spill] sm:$0xff] %v2226_v44  ;;  %vm936_vm8 = vcmp.lt.s32.totalorder %v2063_v26, 127 }
 0x1de   : > { %v341_v58 = vperm.slane %v339_v56, 0 }
 0x1e0   : > { %358 = vperm.xlu0 %1709, %v341_v58   ;;  %352 = vperm.xlu1 %1708, %v341_v58  }
 0x1e1   : > { %346 = vperm.xlu2 %1707, %v341_v58  }
 0x1e8   : > { %1710 = vset.pattern.permute.xlu0 %v1876_v5  ;;  %1712 = vset.pattern.permute.xlu1 %v1875_v24  ;;  %v2228_v24 = vpop.permute.xlu1 %964 }
 0x1e9   : > { %1711 = vset.pattern.permute.xlu2 %v1876_v5  ;;  %1237 = vperm.xlu0 %1710, %v2041_v14   ;;  %3149 = vst [vmem:[#allocation20_spill] sm:$0xff] %v2228_v24  ;;  %v2230_v14 = vpop.permute.xlu0 %790 }
 0x1ea   : > { %1241 = vperm.xlu2 %1711, %v2046_v15   ;;  %1197 = vperm.xlu1 %1712, %v2031_v12   ;;  %v2232_v15 = vpop.permute.xlu2 %956 }
 0x1eb   : > { %3150 = vst [vmem:[#allocation21_spill] sm:$0xff] %v2232_v15 }
 0x1f0   : > { %v2234_v12 = vpop.permute.xlu1 %1027 }
 0x1f1   : > { %3151 = vst [vmem:[#allocation22_spill] sm:$0xff] %v2234_v12  ;;  %v2236_v45 = vpop.permute.xlu0 %857 }
 0x1f2   : > { %1713 = vset.pattern.permute.xlu2 %v2219_v21  ;;  %3152 = vst [vmem:[#allocation23_spill] sm:$0xff] %v2236_v45  ;;  %v2238_v47 = vpop.permute.xlu2 %1023 }
 0x1f3   : > { %3153 = vst [vmem:[#allocation24_spill] sm:$0xff] %v2238_v47 }
 0x1f8   : > { %v2240_v49 = vpop.permute.xlu1 %1035 }
 0x1f9   : > { %3154 = vst [vmem:[#allocation25_spill] sm:$0xff] %v2240_v49  ;;  %v2242_v50 = vpop.permute.xlu0 %889 }
 0x1fa   : > { %364 = vperm.xlu2 %1713, %v341_v58   ;;  %3155 = vst [vmem:[#allocation26_spill] sm:$0xff] %v2242_v50  ;;  %v2244_v51 = vpop.permute.xlu2 %1094 }
 0x1fb   : > { %3156 = vst [vmem:[#allocation27_spill] sm:$0xff] %v2244_v51 }
 0x200   : > { %v2246_v52 = vpop.permute.xlu1 %1098 }
 0x201   : > { %3157 = vst [vmem:[#allocation28_spill] sm:$0xff] %v2246_v52  ;;  %v2248_v53 = vpop.permute.xlu0 %901 }
 0x202   : > { %1714 = vset.pattern.permute.xlu2 %v1876_v5  ;;  %3158 = vst [vmem:[#allocation29_spill] sm:$0xff] %v2248_v53  ;;  %v2250_v55 = vpop.permute.xlu2 %1161 }
 0x203   : > { %3159 = vst [vmem:[#allocation30_spill] sm:$0xff] %v2250_v55 }
 0x208   : > { %v2254_v58 = vpop.permute.xlu1 %1102 }
 0x209   : > { %v2252_v56 = vpop.permute.xlu0 %968  ;;  %3161 = vst [vmem:[#allocation32_spill] sm:$0xff] %v2254_v58 }
 0x20a   : > { %3160 = vst [vmem:[#allocation31_spill] sm:$0xff] %v2252_v56  ;;  %v2256_v5 = vpop.permute.xlu2 %1169 }
 0x20b   : > { %3162 = vst [vmem:[#allocation33_spill] sm:$0xff] %v2256_v5 }
 0x210   : > { %v2258_v21 = vpop.permute.xlu1 %1165 }
 0x211   : > { %3163 = vst [vmem:[#allocation34_spill] sm:$0xff] %v2258_v21  ;;  %v2260_v32 = vpop.permute.xlu0 %1031 }
 0x212   : > { %3164 = vst [vmem:[#allocation35_spill] sm:$0xff] %v2260_v32  ;;  %v2262_v30 = vpop.permute.xlu2 %1221 }
 0x213   : > { %3165 = vst [vmem:[#allocation36_spill] sm:$0xff] %v2262_v30 }
 0x218   : > { %v2264_v34 = vpop.permute.xlu1 %1213 }
 0x219   : > { %3166 = vst [vmem:[#allocation37_spill] sm:$0xff] %v2264_v34  ;;  %v2266_v37 = vpop.permute.xlu0 %1090 }
 0x21a   : > { %3167 = vst [vmem:[#allocation38_spill] sm:$0xff] %v2266_v37  ;;  %v2268_v28 = vpop.permute.xlu2 %1193 }
 0x21b   : > { %3168 = vst [vmem:[#allocation39_spill] sm:$0xff] %v2268_v28 }
 0x220   : > { %v2270_v49 = vpop.permute.xlu1 %1189 }
 0x221   : > { %3169 = vst [vmem:[#allocation40_spill] sm:$0xff] %v2270_v49  ;;  %v2272_v52 = vpop.permute.xlu0 %1157 }
 0x222   : > { %3170 = vst [vmem:[#allocation41_spill] sm:$0xff] %v2272_v52 }
 0x228   : > { %v2274_v58 = vpop.permute.xlu1 %1225 }
 0x229   : > { %3171 = vst [vmem:[#allocation42_spill] sm:$0xff] %v2274_v58  ;;  %v2276_v5 = vpop.permute.xlu0 %1217 }
 0x22a   : > { %3172 = vst [vmem:[#allocation43_spill] sm:$0xff] %v2276_v5 }
 0x23b   : > { %v347_v55 = vpop.permute.xlu2 %346 }
 0x23c   : > { %v2281_v30 = vmul.f32 %v347_v55, %v2008_v2  ;;  %v2284_v12 = vmul.f32 %v347_v55, %v2012_v4 }
 0x23e   : > { %3174 = vst [vmem:[#allocation45_spill] sm:$0xff] %v2281_v30 }
 0x23f   : > { %3175 = vst [vmem:[#allocation46_spill] sm:$0xff] %v2284_v12 }
 0x244   : > { %v2278_v21 = vpop.permute.xlu2 %1241 }
 0x245   : > { %3173 = vst [vmem:[#allocation44_spill] sm:$0xff] %v2278_v21 }
 0x252   : > { %v359_v32 = vpop.permute.xlu0 %358  ;;  %v353_v51 = vpop.permute.xlu1 %352 }
 0x253   : > { %v2287_v28 = vmul.f32 %v353_v51, %v2022_v9  ;;  %v2290_v49 = vmul.f32 %v353_v51, %v2024_v10  ;;  %v2293_v58 = vmul.f32 %v359_v32, %v2004_v0  ;;  %v2296_v21 = vmul.f32 %v359_v32, %v2006_v1 }
 0x254   : > { %v365_v52 = vpop.permute.xlu2 %364 }
 0x255   : > { %3176 = vst [vmem:[#allocation47_spill] sm:$0xff] %v2287_v28  ;;  %v374_v2 = vadd.f32 %v2287_v28, %v2281_v30  ;;  %v383_v4 = vadd.f32 %v2290_v49, %v2284_v12  ;;  %v2305_v10 = vmul.f32 %v365_v52, %v2016_v6  ;;  %v2308_v51 = vmul.f32 %v365_v52, %v2018_v7 }
 0x256   : > { %3177 = vst [vmem:[#allocation48_spill] sm:$0xff] %v2290_v49 }
 0x257   : > { %3178 = vst [vmem:[#allocation49_spill] sm:$0xff] %v2293_v58  ;;  %v375_v55 = vadd.f32 %v374_v2, %v2293_v58  ;;  %v384_v9 = vadd.f32 %v383_v4, %v2296_v21 }
 0x258   : > { %3179 = vst [vmem:[#allocation50_spill] sm:$0xff] %v2296_v21 }
 0x259   : > { %3180 = vst [vmem:[#allocation51_spill] sm:$0xff] %v2305_v10  ;;  %v376_v0 = vadd.f32 %v375_v55, %v2305_v10  ;;  %v385_v1 = vadd.f32 %v384_v9, %v2308_v51 }
 0x25a   : > { %3181 = vst [vmem:[#allocation52_spill] sm:$0xff] %v2308_v51 }
 0x25b   : > { %v377_v32 = vrot.slane %v376_v0, 4  ;;  %v386_v5 = vrot.slane %v385_v1, 4 }
 0x25d   : > { %v378_v34 = vadd.f32 %v377_v32, %v376_v0  ;;  %v387_v37 = vadd.f32 %v386_v5, %v385_v1 }
 0x25f   : > { %v379_v47 = vrot.slane %v378_v34, 2  ;;  %v388_v24 = vrot.slane %v387_v37, 2 }
 0x261   : > { %v380_v61 = vadd.f32 %v379_v47, %v378_v34  ;;  %v389_v2 = vadd.f32 %v388_v24, %v387_v37 }
 0x263   : > { %v381_v39 = vrot.slane %v380_v61, 1  ;;  %v390_v4 = vrot.slane %v389_v2, 1 }
 0x265   : > { %v382_v56 = vadd.f32 %v381_v39, %v380_v61  ;;  %v391_v6 = vadd.f32 %v390_v4, %v389_v2 }
 0x267   : > { %v392_v44 = vmul.f32 0.03125, %v382_v56  ;;  %v393_v53 = vmul.f32 0.03125, %v391_v6 }
 0x269   : > { %v2313_v7 = vsub.f32 %v2281_v30, %v392_v44  ;;  %v2316_v52 = vsub.f32 %v2284_v12, %v393_v53  ;;  %v396_v55 = vsub.f32 %v2287_v28, %v392_v44  ;;  %v397_v5 = vsub.f32 %v2290_v49, %v393_v53 }
 0x26a   : > { %v398_v9 = vsub.f32 %v2293_v58, %v392_v44  ;;  %v399_v34 = vsub.f32 %v2296_v21, %v393_v53  ;;  %v400_v37 = vsub.f32 %v2305_v10, %v392_v44  ;;  %v401_v61 = vsub.f32 %v2308_v51, %v393_v53 }
 0x26b   : > { %v402_v39 = vmul.f32 %v2313_v7, %v2313_v7  ;;  %v403_v24 = vmul.f32 %v2316_v52, %v2316_v52  ;;  %v404_v47 = vmul.f32 %v396_v55, %v396_v55  ;;  %v405_v56 = vmul.f32 %v397_v5, %v397_v5 }
 0x26c   : > { %v406_v0 = vmul.f32 %v398_v9, %v398_v9  ;;  %v407_v1 = vmul.f32 %v399_v34, %v399_v34  ;;  %v408_v4 = vmul.f32 %v400_v37, %v400_v37  ;;  %v409_v6 = vmul.f32 %v401_v61, %v401_v61 }
 0x26d   : > { %v410_v32 = vadd.f32 %v404_v47, %v402_v39  ;;  %v419_v2 = vadd.f32 %v405_v56, %v403_v24 }
 0x26f   : > { %v411_v58 = vadd.f32 %v410_v32, %v406_v0  ;;  %v420_v21 = vadd.f32 %v419_v2, %v407_v1 }
 0x271   : > { %v412_v12 = vadd.f32 %v411_v58, %v408_v4  ;;  %v421_v44 = vadd.f32 %v420_v21, %v409_v6 }
 0x273   : > { %v413_v10 = vrot.slane %v412_v12, 4  ;;  %v422_v53 = vrot.slane %v421_v44, 4 }
 0x275   : > { %v414_v51 = vadd.f32 %v413_v10, %v412_v12  ;;  %v423_v30 = vadd.f32 %v422_v53, %v421_v44 }
 0x277   : > { %v415_v49 = vrot.slane %v414_v51, 2  ;;  %v424_v28 = vrot.slane %v423_v30, 2 }
 0x279   : > { %v416_v48 = vadd.f32 %v415_v49, %v414_v51  ;;  %v425_v35 = vadd.f32 %v424_v28, %v423_v30 }
 0x27b   : > { %v417_v15 = vrot.slane %v416_v48, 1  ;;  %v426_v50 = vrot.slane %v425_v35, 1 }
 0x27d   : > { %v418_v45 = vadd.f32 %v417_v15, %v416_v48  ;;  %v427_v59 = vadd.f32 %v426_v50, %v425_v35 }
 0x27f   : > { %v428_v39 = vmul.f32 0.03125, %v418_v45  ;;  %v429_v24 = vmul.f32 0.03125, %v427_v59 }
 0x281   : > { %v430_v47 = vadd.f32 1e-06, %v428_v39  ;;  %v431_v56 = vadd.f32 1e-06, %v429_v24 }
 0x283   : > { %1731 = vrsqrt.f32 %v430_v47  ;;  %vm438_vm11 = vweird.f32 %v430_v47  ;;  %vm448_vm13 = vweird.f32 %v431_v56 }
 0x284   : > { %1733 = vrsqrt.f32 %v431_v56 }
 0x289   : > { %v1732_v58 = vpop.eup %1731 }
 0x28a   : > { %v1734_v21 = vpop.eup %1733  ;;  %v433_v0 = vmul.f32 %v1732_v58, %v430_v47  ;;  %vm439_vm9 = vweird.f32 %v1732_v58 }
 0x28b   : > { %v443_v1 = vmul.f32 %v1734_v21, %v431_v56  ;;  %vm449_vm10 = vweird.f32 %v1734_v21  ;;  %vm440_vm12 = vmor %vm438_vm11, %vm439_vm9  ;;  %vm1003_vm9 = vcmp.lt.s32.totalorder %v2063_v26, 113  ;;  %vm1137_vm11 = vcmp.lt.s32.totalorder %v2063_v26, 111 }
 0x28c   : > { %v434_v12 = vmul.f32 %v1732_v58, %v433_v0  ;;  %vm450_vm14 = vmor %vm448_vm13, %vm449_vm10  ;;  %vm1070_vm10 = vcmp.lt.s32.totalorder %v2063_v26, 112 }
 0x28d   : > { %v444_v10 = vmul.f32 %v1734_v21, %v443_v1 }
 0x28e   : > { %v435_v32 = vmul.f32 0.5, %v434_v12 }
 0x28f   : > { %v445_v2 = vmul.f32 0.5, %v444_v10 }
 0x290   : > { %v436_v49 = vsub.f32 1.5, %v435_v32 }
 0x291   : > { %v446_v28 = vsub.f32 1.5, %v445_v2 }
 0x292   : > { %v437_v30 = vmul.f32 %v1732_v58, %v436_v49 }
 0x293   : > { %v447_v48 = vmul.f32 %v1734_v21, %v446_v28 }
 0x294   : > { %v441_v59 = vsel %vm440_vm12, %v1732_v58, %v437_v30 }
 0x295   : > { %v451_v35 = vsel %vm450_vm14, %v1734_v21, %v447_v48  ;;  %v454_v15 = vmul.f32 %v441_v59, %v396_v55  ;;  %v456_v45 = vmul.f32 %v441_v59, %v398_v9  ;;  %v458_v50 = vmul.f32 %v441_v59, %v400_v37 }
 0x296   : > { %v455_v51 = vmul.f32 %v451_v35, %v397_v5  ;;  %v457_v4 = vmul.f32 %v451_v35, %v399_v34  ;;  %v459_v6 = vmul.f32 %v451_v35, %v401_v61  ;;  %v452_v44 = vmul.f32 %v441_v59, %v2313_v7 }
 0x297   : > { %v478_v53 = vmul.f32 %v2143_v11, %v454_v15  ;;  %v480_v39 = vmul.f32 %v2136_v3, %v456_v45  ;;  %v482_v24 = vmul.f32 %v2191_v40, %v458_v50  ;;  %v453_v47 = vmul.f32 %v451_v35, %v2316_v52 }
 0x298   : > { %v479_v56 = vmul.f32 %v2143_v11, %v455_v51  ;;  %v481_v58 = vmul.f32 %v2136_v3, %v457_v4  ;;  %v483_v55 = vmul.f32 %v2191_v40, %v459_v6  ;;  %v476_v5 = vmul.f32 %v2130_v62, %v452_v44 }
 0x299   : > { %v2338_v9 = vadd.f32 %v2141_v8, %v478_v53  ;;  %v2341_v7 = vadd.f32 %v2154_v19, %v480_v39  ;;  %v2344_v34 = vadd.f32 %v2146_v16, %v482_v24  ;;  %v477_v37 = vmul.f32 %v2130_v62, %v453_v47 }
 0x29a   : > { %v2348_v52 = vadd.f32 %v2141_v8, %v479_v56  ;;  %v2351_v3 = vadd.f32 %v2154_v19, %v481_v58  ;;  %v2354_v11 = vadd.f32 %v2146_v16, %v483_v55  ;;  %v2357_v40 = vadd.f32 %v2149_v17, %v476_v5 }
 0x29b   : > { %v526_v61 = vmul.f32 %v2158_v22, %v2338_v9  ;;  %v528_v21 = vmul.f32 %v2151_v18, %v2341_v7  ;;  %v530_v62 = vmul.f32 %v2164_v25, %v2344_v34  ;;  %v2366_v8 = vadd.f32 %v2149_v17, %v477_v37 }
 0x29c   : > { %v527_v19 = vmul.f32 %v2158_v22, %v2348_v52  ;;  %v531_v16 = vmul.f32 %v2164_v25, %v2354_v11  ;;  %v524_v0 = vmul.f32 %v2197_v46, %v2357_v40  ;;  %v529_v25 = vmul.f32 %v2151_v18, %v2351_v3 }
 0x29d   : > { %v550_v1 = vadd.f32 %v2203_v57, %v526_v61  ;;  %v552_v12 = vadd.f32 %v2169_v29, %v528_v21  ;;  %v2377_v10 = vadd.f32 %v2160_v23, %v530_v62  ;;  %v525_v22 = vmul.f32 %v2197_v46, %v2366_v8 }
 0x29e   : > { %v2380_v32 = vadd.f32 %v2203_v57, %v527_v19  ;;  %v2383_v17 = vadd.f32 %v2160_v23, %v531_v16  ;;  %v548_v28 = vadd.f32 %v2156_v20, %v524_v0  ;;  %v2396_v46 = vadd.f32 %v2169_v29, %v529_v25 }
 0x29f   : > { %v566_v2 = vmul.f32 0.044715, %v550_v1  ;;  %v568_v30 = vmul.f32 0.044715, %v552_v12  ;;  %v570_v48 = vmul.f32 0.044715, %v2377_v10  ;;  %v549_v35 = vadd.f32 %v2156_v20, %v525_v22 }
 0x2a0   : > { %v567_v49 = vmul.f32 0.044715, %v2380_v32  ;;  %v571_v57 = vmul.f32 0.044715, %v2383_v17  ;;  %v564_v51 = vmul.f32 0.044715, %v548_v28 }
 0x2a1   : > { %v574_v59 = vmul.f32 %v566_v2, %v550_v1  ;;  %v576_v15 = vmul.f32 %v568_v30, %v552_v12  ;;  %v578_v18 = vmul.f32 %v570_v48, %v2377_v10  ;;  %v565_v39 = vmul.f32 0.044715, %v549_v35 }
 0x2a2   : > { %v575_v23 = vmul.f32 %v567_v49, %v2380_v32  ;;  %v579_v4 = vmul.f32 %v571_v57, %v2383_v17  ;;  %v572_v24 = vmul.f32 %v564_v51, %v548_v28  ;;  %v569_v20 = vmul.f32 0.044715, %v2396_v46 }
 0x2a3   : > { %v582_v45 = vmul.f32 %v574_v59, %v550_v1  ;;  %v584_v6 = vmul.f32 %v576_v15, %v552_v12  ;;  %v586_v29 = vmul.f32 %v578_v18, %v2377_v10  ;;  %v573_v58 = vmul.f32 %v565_v39, %v549_v35 }
 0x2a4   : > { %v583_v50 = vmul.f32 %v575_v23, %v2380_v32  ;;  %v580_v55 = vmul.f32 %v572_v24, %v548_v28  ;;  %v587_v5 = vmul.f32 %v579_v4, %v2383_v17  ;;  %v577_v19 = vmul.f32 %v569_v20, %v2396_v46 }
 0x2a5   : > { %v590_v44 = vadd.f32 %v582_v45, %v550_v1  ;;  %v592_v47 = vadd.f32 %v584_v6, %v552_v12  ;;  %v581_v21 = vmul.f32 %v573_v58, %v549_v35  ;;  %v594_v16 = vadd.f32 %v586_v29, %v2377_v10 }
 0x2a6   : > { %v591_v53 = vadd.f32 %v583_v50, %v2380_v32  ;;  %v588_v62 = vadd.f32 %v580_v55, %v548_v28  ;;  %v595_v25 = vadd.f32 %v587_v5, %v2383_v17  ;;  %v585_v30 = vmul.f32 %v577_v19, %v2396_v46 }
 0x2a7   : > { %v598_v56 = vmul.f32 0.7978846, %v590_v44  ;;  %v600_v37 = vmul.f32 0.7978846, %v592_v47  ;;  %v589_v0 = vadd.f32 %v581_v21, %v549_v35  ;;  %v602_v48 = vmul.f32 0.7978846, %v594_v16 }
 0x2a8   : > { %v599_v61 = vmul.f32 0.7978846, %v591_v53  ;;  %v596_v22 = vmul.f32 0.7978846, %v588_v62  ;;  %v558_v59 = vmul.f32 0.5, %v550_v1  ;;  %v560_v18 = vmul.f32 0.5, %v552_v12 }
 0x2a9   : > { %1735 = vtanh.f32 %v598_v56  ;;  %v597_v2 = vmul.f32 0.7978846, %v589_v0  ;;  %v603_v15 = vmul.f32 0.7978846, %v595_v25  ;;  %v593_v51 = vadd.f32 %v585_v30, %v2396_v46  ;;  %v2492_v25 = vpop.permute.xlu0 %1237 }
 0x2aa   : > { %1737 = vtanh.f32 %v600_v37  ;;  %v556_v53 = vmul.f32 0.5, %v548_v28  ;;  %v557_v29 = vmul.f32 0.5, %v549_v35  ;;  %v559_v58 = vmul.f32 0.5, %v2380_v32 }
 0x2ab   : > { %1739 = vtanh.f32 %v599_v61  ;;  %v601_v12 = vmul.f32 0.7978846, %v593_v51  ;;  %v562_v35 = vmul.f32 0.5, %v2377_v10  ;;  %v563_v32 = vmul.f32 0.5, %v2383_v17 }
 0x2ac   : > { %1741 = vtanh.f32 %v596_v22  ;;  %v561_v10 = vmul.f32 0.5, %v2396_v46  ;;  %v2488_v22 = vpop.permute.xlu1 %1197 }
 0x2ad   : > { %1743 = vtanh.f32 %v597_v2 }
 0x2ae   : > { %1745 = vtanh.f32 %v602_v48 }
 0x2af   : > { %v1736_v49 = vpop.eup %1735  ;;  %1747 = vtanh.f32 %v603_v15 }
 0x2b0   : > { %v614_v57 = vadd.f32 1.0, %v1736_v49  ;;  %v1738_v23 = vpop.eup %1737  ;;  %1749 = vtanh.f32 %v601_v12 }
 0x2b1   : > { %v616_v45 = vadd.f32 1.0, %v1738_v23  ;;  %v1740_v4 = vpop.eup %1739 }
 0x2b2   : > { %v2409_v50 = vmul.f32 %v614_v57, %v558_v59  ;;  %v1742_v44 = vpop.eup %1741  ;;  %v615_v20 = vadd.f32 1.0, %v1740_v4 }
 0x2b3   : > { %v2412_v6 = vmul.f32 %v616_v45, %v560_v18  ;;  %v1744_v1 = vpop.eup %1743  ;;  %v612_v39 = vadd.f32 1.0, %v1742_v44  ;;  %v2526_v44 = vld [vmem:[%s3085_s2] sm:$0xff] }
 0x2b4   : > { %630 = vrot.lane.b32.xlu1 %v2409_v50, %s1877_s22  ;;  %v613_v24 = vadd.f32 1.0, %v1744_v1  ;;  %v1746_v56 = vpop.eup %1745  ;;  %v2425_v37 = vmul.f32 %v615_v20, %v559_v58  ;;  %v2533_v1 = vld [vmem:[%s3085_s2 + $0x8] sm:$0xff] }
 0x2b5   : > { %632 = vrot.lane.b32.xlu0 %v2412_v6, %s1877_s22  ;;  %v2418_v47 = vmul.f32 %v612_v39, %v556_v53  ;;  %v1748_v5 = vpop.eup %1747  ;;  %v618_v28 = vadd.f32 1.0, %v1746_v56  ;;  %v653_v39 = vperm.slane %v2526_v44, 0  ;;  %v654_v12 = vperm.slane %v2533_v1, 0 }
 0x2b6   : > { %v2421_v55 = vmul.f32 %v613_v24, %v557_v29  ;;  %v619_v61 = vadd.f32 1.0, %v1748_v5  ;;  %v1750_v62 = vpop.eup %1749  ;;  %v2543_v24 = vperm.slane %v2526_v44, 1  ;;  %v2546_v20 = vperm.slane %v2533_v1, 1 }
 0x2b7   : > { %628 = vrot.lane.b32.xlu2 %v2418_v47, %s1877_s22  ;;  %v2433_v21 = vmul.f32 %v618_v28, %v562_v35  ;;  %v617_v16 = vadd.f32 1.0, %v1750_v62 }
 0x2b8   : > { %v2435_v19 = vmul.f32 %v619_v61, %v563_v32 }
 0x2b9   : > { %v2444_v0 = vmul.f32 %v617_v16, %v561_v10 }
 0x2bc   : > { %636 = vrot.lane.b32.xlu1 %v2421_v55, %s1877_s22 }
 0x2bd   : > { %638 = vrot.lane.b32.xlu0 %v2425_v37, %s1877_s22 }
 0x2bf   : > { %634 = vrot.lane.b32.xlu2 %v2433_v21, %s1877_s22 }
 0x2c4   : > { %642 = vrot.lane.b32.xlu1 %v2435_v19, %s1877_s22 }
 0x2c5   : > { %689 = vrot.lane.b32.xlu0 %v2409_v50, %s1878_s27 }
 0x2c7   : > { %640 = vrot.lane.b32.xlu2 %v2444_v0, %s1877_s22  ;;  %s1805_s22 = scalar_lea.hbm %s1804_s20, 64 }
 0x2c8   : > { %p1806_p6 = scmp.ne.s32.totalorder %s1804_s20, %s1805_s22 }
 0x2ca   : > { %p1807_p9 = pnand %p1806_p6, %p1958_p11 }
 0x2cc   : > { %687 = vrot.lane.b32.xlu1 %v2418_v47, %s1878_s27  ;;  %p1808_p13 = pneg %p1807_p9 }
 0x2cd   : > { %695 = vrot.lane.b32.xlu0 %v2421_v55, %s1878_s27 }
 0x2cf   : > { %691 = vrot.lane.b32.xlu2 %v2412_v6, %s1878_s27 }
 0x2d4   : > { %693 = vrot.lane.b32.xlu1 %v2433_v21, %s1878_s27 }
 0x2d5   : > { %701 = vrot.lane.b32.xlu0 %v2435_v19, %s1878_s27 }
 0x2d7   : > { %697 = vrot.lane.b32.xlu2 %v2425_v37, %s1878_s27 }
 0x2dc   : > { %699 = vrot.lane.b32.xlu1 %v2444_v0, %s1878_s27 }
 0x2dd   : > { %760 = vrot.lane.b32.xlu0 %v2433_v21, %s1879_s26 }
 0x2df   : > { %756 = vrot.lane.b32.xlu2 %v2409_v50, %s1879_s26 }
 0x2e4   : > { %754 = vrot.lane.b32.xlu1 %v2418_v47, %s1879_s26 }
 0x2e5   : > { %766 = vrot.lane.b32.xlu0 %v2444_v0, %s1879_s26 }
 0x2e7   : > { %762 = vrot.lane.b32.xlu2 %v2421_v55, %s1879_s26 }
 0x2ec   : > { %758 = vrot.lane.b32.xlu1 %v2412_v6, %s1879_s26 }
 0x2ed   : > { %823 = vrot.lane.b32.xlu0 %v2409_v50, %s1880_s28 }
 0x2ef   : > { %768 = vrot.lane.b32.xlu2 %v2435_v19, %s1879_s26 }
 0x2f4   : > { %764 = vrot.lane.b32.xlu1 %v2425_v37, %s1879_s26 }
 0x2f5   : > { %827 = vrot.lane.b32.xlu0 %v2433_v21, %s1880_s28 }
 0x2f7   : > { %829 = vrot.lane.b32.xlu2 %v2421_v55, %s1880_s28 }
 0x2fc   : > { %821 = vrot.lane.b32.xlu1 %v2418_v47, %s1880_s28 }
 0x2fd   : > { %928 = vrot.lane.b32.xlu0 %v2421_v55, %s1881_s4 }
 0x2ff   : > { %833 = vrot.lane.b32.xlu2 %v2444_v0, %s1880_s28 }
 0x304   : > { %831 = vrot.lane.b32.xlu1 %v2425_v37, %s1880_s28 }
 0x305   : > { %926 = vrot.lane.b32.xlu0 %v2433_v21, %s1881_s4 }
 0x307   : > { %835 = vrot.lane.b32.xlu2 %v2435_v19, %s1880_s28 }
 0x30c   : > { %825 = vrot.lane.b32.xlu1 %v2412_v6, %s1880_s28 }
 0x30d   : > { %989 = vrot.lane.b32.xlu0 %v2409_v50, %s1882_s6 }
 0x30f   : > { %920 = vrot.lane.b32.xlu2 %v2418_v47, %s1881_s4 }
 0x311   : > { %v629_v17 = vpop.permute.xlu2 %628 }
 0x314   : > { %922 = vrot.lane.b32.xlu1 %v2409_v50, %s1881_s4 }
 0x315   : > { %991 = vrot.lane.b32.xlu0 %v2412_v6, %s1882_s6 }
 0x317   : > { %930 = vrot.lane.b32.xlu2 %v2425_v37, %s1881_s4 }
 0x319   : > { %v635_v46 = vpop.permute.xlu2 %634 }
 0x31c   : > { %924 = vrot.lane.b32.xlu1 %v2412_v6, %s1881_s4 }
 0x31d   : > { %993 = vrot.lane.b32.xlu0 %v2433_v21, %s1882_s6 }
 0x31f   : > { %932 = vrot.lane.b32.xlu2 %v2444_v0, %s1881_s4 }
 0x321   : > { %v641_v2 = vpop.permute.xlu2 %640 }
 0x324   : > { %987 = vrot.lane.b32.xlu1 %v2418_v47, %s1882_s6 }
 0x325   : > { %1056 = vrot.lane.b32.xlu0 %v2409_v50, %s1883_s23 }
 0x326   : > { %v631_v49 = vpop.permute.xlu1 %630 }
 0x327   : > { %v633_v30 = vpop.permute.xlu0 %632  ;;  %934 = vrot.lane.b32.xlu2 %v2435_v19, %s1881_s4  ;;  %s1809_s4 = scalar_lea.hbm %s3086_s3, 128 }
 0x328   : > { %v2502_v48 = vsel %vm644_vm15, %v633_v30, %v641_v2  ;;  %v2506_v59 = vsel %vm644_vm15, %v641_v2, %v633_v30  ;;  %p1811_p1 = scmp.lt.s32.totalorder %s1809_s4, %s1805_s22 }
 0x329   : > { %v2509_v57 = vpop.permute.xlu2 %691 }
 0x32a   : > { %p1812_p3 = por %p1811_p1, %p1810_p0 }
 0x32c   : > { %997 = vrot.lane.b32.xlu1 %v2425_v37, %s1882_s6  ;;  %p1813_p4 = pnand %p1812_p3, %p1808_p13 }
 0x32d   : > { %1129 = vrot.lane.b32.xlu0 %v2421_v55, %s1884_s5 }
 0x32e   : > { %v637_v23 = vpop.permute.xlu1 %636 }
 0x32f   : > { %v645_v15 = vsel %vm644_vm15, %v629_v17, %v637_v23  ;;  %v649_v18 = vsel %vm644_vm15, %v637_v23, %v629_v17  ;;  %v639_v45 = vpop.permute.xlu0 %638  ;;  %995 = vrot.lane.b32.xlu2 %v2421_v55, %s1882_s6 }
 0x330   : > { %v646_v51 = vsel %vm644_vm15, %v631_v49, %v639_v45  ;;  %v650_v4 = vsel %vm644_vm15, %v639_v45, %v631_v49  ;;  %v2575_v45 = vld [vmem:[%s3084_s1 + $0x18] sm:$0xff] }
 0x331   : > { %v698_v53 = vpop.permute.xlu2 %697  ;;  %v657_v5 = vmul.f32 %v653_v39, %v650_v4  ;;  %v658_v28 = vmul.f32 %v654_v12, %v646_v51  ;;  %v655_v51 = vmul.f32 %v653_v39, %v649_v18  ;;  %v656_v4 = vmul.f32 %v654_v12, %v645_v15 }
 0x333   : > { %v681_v10 = vmul.f32 %v2185_v13, %v657_v5  ;;  %v682_v17 = vmul.f32 %v2185_v13, %v658_v28 }
 0x334   : > { %1054 = vrot.lane.b32.xlu1 %v2418_v47, %s1883_s23 }
 0x335   : > { %1127 = vrot.lane.b32.xlu0 %v2433_v21, %s1884_s5 }
 0x336   : > { %v643_v29 = vpop.permute.xlu1 %642 }
 0x337   : > { %v648_v56 = vsel %vm644_vm15, %v635_v46, %v643_v29  ;;  %v652_v58 = vsel %vm644_vm15, %v643_v29, %v635_v46  ;;  %v690_v35 = vpop.permute.xlu0 %689  ;;  %999 = vrot.lane.b32.xlu2 %v2444_v0, %s1882_s6 }
 0x338   : > { %v705_v61 = vsel %vm703_vm5, %v690_v35, %v698_v53  ;;  %v709_v32 = vsel %vm703_vm5, %v698_v53, %v690_v35  ;;  %v679_v35 = vmul.f32 %v2211_v63, %v655_v51 }
 0x339   : > { %v716_v62 = vmul.f32 %v2543_v24, %v709_v32  ;;  %v717_v16 = vmul.f32 %v2546_v20, %v705_v61  ;;  %v2564_v49 = vpop.permute.xlu2 %756  ;;  %v680_v61 = vmul.f32 %v2211_v63, %v656_v4 }
 0x33b   : > { %v740_v46 = vmul.f32 %v2181_v33, %v716_v62  ;;  %v741_v2 = vmul.f32 %v2181_v33, %v717_v16 }
 0x33c   : > { %1064 = vrot.lane.b32.xlu1 %v2425_v37, %s1883_s23 }
 0x33d   : > { %v2568_v30 = vadd.f32 %v740_v46, %v681_v10  ;;  %v2570_v23 = vadd.f32 %v741_v2, %v682_v17  ;;  %1249 = vperm.xlu0 %1710, %v2575_v45   ;;  %v661_v17 = vmul.f32 %v653_v39, %v652_v58  ;;  %v662_v46 = vmul.f32 %v654_v12, %v648_v56 }
 0x33e   : > { %v688_v13 = vpop.permute.xlu1 %687 }
 0x33f   : > { %v696_v33 = vpop.permute.xlu0 %695  ;;  %1001 = vrot.lane.b32.xlu2 %v2435_v19, %s1882_s6  ;;  %v685_v4 = vmul.f32 %v2189_v38, %v661_v17 }
 0x340   : > { %v704_v53 = vsel %vm703_vm5, %v688_v13, %v696_v33  ;;  %v708_v29 = vsel %vm703_vm5, %v696_v33, %v688_v13 }
 0x341   : > { %v714_v5 = vmul.f32 %v2543_v24, %v708_v29  ;;  %v715_v28 = vmul.f32 %v2546_v20, %v704_v53  ;;  %v763_v32 = vpop.permute.xlu2 %762  ;;  %v659_v53 = vmul.f32 %v653_v39, %v2506_v59  ;;  %v660_v29 = vmul.f32 %v654_v12, %v2502_v48 }
 0x343   : > { %v738_v15 = vmul.f32 %v2195_v43, %v714_v5  ;;  %v739_v18 = vmul.f32 %v2195_v43, %v715_v28  ;;  %v683_v12 = vmul.f32 %v2166_v27, %v659_v53 }
 0x344   : > { %1066 = vrot.lane.b32.xlu1 %v2444_v0, %s1883_s23 }
 0x345   : > { %v746_v62 = vadd.f32 %v738_v15, %v679_v35  ;;  %v747_v16 = vadd.f32 %v739_v18, %v680_v61  ;;  %1718 = vset.pattern.permute.xlu0 %v2175_v31  ;;  %v686_v31 = vmul.f32 %v2189_v38, %v662_v46  ;;  %v779_v35 = vperm.slane %v2526_v44, 2 }
 0x346   : > { %v694_v10 = vpop.permute.xlu1 %693  ;;  %v780_v38 = vperm.slane %v2533_v1, 2  ;;  %v684_v18 = vmul.f32 %v2166_v27, %v660_v29 }
 0x347   : > { %v702_v2 = vpop.permute.xlu0 %701  ;;  %1062 = vrot.lane.b32.xlu2 %v2421_v55, %s1883_s23 }
 0x348   : > { %v707_v13 = vsel %vm703_vm5, %v694_v10, %v702_v2  ;;  %v711_v63 = vsel %vm703_vm5, %v702_v2, %v694_v10 }
 0x349   : > { %v720_v43 = vmul.f32 %v2543_v24, %v711_v63  ;;  %v721_v51 = vmul.f32 %v2546_v20, %v707_v13  ;;  %v769_v33 = vpop.permute.xlu2 %768 }
 0x34b   : > { %v744_v56 = vmul.f32 %v2201_v54, %v720_v43  ;;  %v745_v58 = vmul.f32 %v2201_v54, %v721_v51 }
 0x34c   : > { %1068 = vrot.lane.b32.xlu1 %v2435_v19, %s1883_s23 }
 0x34d   : > { %v752_v5 = vadd.f32 %v744_v56, %v685_v4  ;;  %v753_v28 = vadd.f32 %v745_v58, %v686_v31 }
 0x34e   : > { %v700_v61 = vpop.permute.xlu1 %699 }
 0x34f   : > { %v706_v54 = vsel %vm703_vm5, %v2509_v57, %v700_v61  ;;  %v710_v15 = vsel %vm703_vm5, %v700_v61, %v2509_v57  ;;  %v761_v59 = vpop.permute.xlu0 %760  ;;  %1058 = vrot.lane.b32.xlu2 %v2412_v6, %s1883_s23 }
 0x350   : > { %v718_v48 = vmul.f32 %v2543_v24, %v710_v15  ;;  %v719_v39 = vmul.f32 %v2546_v20, %v706_v54  ;;  %v774_v10 = vsel %vm770_vm6, %v761_v59, %v769_v33  ;;  %v778_v17 = vsel %vm770_vm6, %v769_v33, %v761_v59 }
 0x351   : > { %v787_v46 = vmul.f32 %v779_v35, %v778_v17  ;;  %v788_v57 = vmul.f32 %v780_v38, %v774_v10  ;;  %v830_v43 = vpop.permute.xlu2 %829  ;;  %v2661_v10 = vperm.slane %v2526_v44, 3  ;;  %v2664_v17 = vperm.slane %v2533_v1, 3 }
 0x352   : > { %v742_v2 = vmul.f32 %v2223_v41, %v718_v48  ;;  %v743_v24 = vmul.f32 %v2223_v41, %v719_v39 }
 0x353   : > { %v811_v20 = vmul.f32 %v2193_v42, %v787_v46  ;;  %v812_v13 = vmul.f32 %v2193_v42, %v788_v57 }
 0x354   : > { %v750_v27 = vadd.f32 %v742_v2, %v683_v12  ;;  %v751_v63 = vadd.f32 %v743_v24, %v684_v18  ;;  %1123 = vrot.lane.b32.xlu1 %v2409_v50, %s1884_s5 }
 0x355   : > { %v819_v51 = vadd.f32 %v811_v20, %v752_v5  ;;  %v820_v4 = vadd.f32 %v812_v13, %v753_v28 }
 0x356   : > { %v755_v31 = vpop.permute.xlu1 %754 }
 0x357   : > { %v771_v56 = vsel %vm770_vm6, %v755_v31, %v763_v32  ;;  %v775_v58 = vsel %vm770_vm6, %v763_v32, %v755_v31  ;;  %v767_v41 = vpop.permute.xlu0 %766  ;;  %1060 = vrot.lane.b32.xlu2 %v2433_v21, %s1883_s23 }
 0x358   : > { %v781_v33 = vmul.f32 %v779_v35, %v775_v58  ;;  %v782_v53 = vmul.f32 %v780_v38, %v771_v56  ;;  %v3182_v58 = vld [vmem:[#allocation14_spill] sm:$0xff] }
 0x359   : > { %v2642_v28 = vpop.permute.xlu2 %833 }
 0x35a   : > { %v805_v42 = vmul.f32 %v2230_v14, %v781_v33  ;;  %v806_v29 = vmul.f32 %v2230_v14, %v782_v53 }
 0x35c   : > { %v813_v61 = vadd.f32 %v805_v42, %v746_v62  ;;  %v814_v5 = vadd.f32 %v806_v29, %v747_v16  ;;  %1125 = vrot.lane.b32.xlu1 %v2412_v6, %s1884_s5 }
 0x35e   : > { %v759_v54 = vpop.permute.xlu1 %758 }
 0x35f   : > { %v773_v32 = vsel %vm770_vm6, %v759_v54, %v767_v41  ;;  %v777_v15 = vsel %vm770_vm6, %v767_v41, %v759_v54  ;;  %v824_v59 = vpop.permute.xlu0 %823  ;;  %1121 = vrot.lane.b32.xlu2 %v2418_v47, %s1884_s5  ;;  %v2688_v54 = vperm.slane %v2526_v44, 5 }
 0x360   : > { %v785_v48 = vmul.f32 %v779_v35, %v777_v15  ;;  %v786_v39 = vmul.f32 %v780_v38, %v773_v32  ;;  %v2691_v32 = vperm.slane %v2533_v1, 5 }
 0x361   : > { %v836_v18 = vpop.permute.xlu2 %835 }
 0x362   : > { %v809_v14 = vmul.f32 %v2187_v36, %v785_v48  ;;  %v810_v62 = vmul.f32 %v2187_v36, %v786_v39 }
 0x364   : > { %v2654_v16 = vadd.f32 %v809_v14, %v750_v27  ;;  %v2656_v12 = vadd.f32 %v810_v62, %v751_v63  ;;  %1201 = vperm.xlu1 %1712, %v2575_v45  }
 0x366   : > { %v765_v46 = vpop.permute.xlu1 %764 }
 0x367   : > { %v772_v36 = vsel %vm770_vm6, %v2564_v49, %v765_v46  ;;  %v776_v57 = vsel %vm770_vm6, %v765_v46, %v2564_v49  ;;  %v828_v2 = vpop.permute.xlu0 %827  ;;  %1131 = vrot.lane.b32.xlu2 %v2425_v37, %s1884_s5 }
 0x368   : > { %v783_v24 = vmul.f32 %v779_v35, %v776_v57  ;;  %v784_v20 = vmul.f32 %v780_v38, %v772_v36  ;;  %v841_v13 = vsel %vm837_vm7, %v828_v2, %v836_v18  ;;  %v845_v27 = vsel %vm837_vm7, %v836_v18, %v828_v2  ;;  %v3183_v18 = vld [vmem:[#allocation23_spill] sm:$0xff]  ;;  %v3184_v36 = vld [vmem:[#allocation26_spill] sm:$0xff] }
 0x369   : > { %v854_v63 = vmul.f32 %v2661_v10, %v845_v27  ;;  %v855_v31 = vmul.f32 %v2664_v17, %v841_v13  ;;  %v921_v53 = vpop.permute.xlu2 %920  ;;  %v905_v57 = vmul.f32 %v3184_v36, %v2421_v55  ;;  %v3185_v27 = vld [vmem:[#allocation21_spill] sm:$0xff] }
 0x36a   : > { %v807_v56 = vmul.f32 %v2207_v60, %v783_v24  ;;  %v808_v49 = vmul.f32 %v2207_v60, %v784_v20  ;;  %v904_v20 = vmul.f32 %v3184_v36, %v2418_v47 }
 0x36b   : > { %v878_v35 = vmul.f32 %v3182_v58, %v854_v63  ;;  %v879_v38 = vmul.f32 %v3182_v58, %v855_v31 }
 0x36c   : > { %v815_v41 = vadd.f32 %v807_v56, %v2568_v30  ;;  %v816_v33 = vadd.f32 %v808_v49, %v2570_v23 }
 0x36d   : > { %v886_v42 = vadd.f32 %v878_v35, %v819_v51  ;;  %v887_v29 = vadd.f32 %v879_v38, %v820_v4 }
 0x36e   : > { %v822_v60 = vpop.permute.xlu1 %821 }
 0x36f   : > { %v838_v15 = vsel %vm837_vm7, %v822_v60, %v830_v43  ;;  %v842_v30 = vsel %vm837_vm7, %v830_v43, %v822_v60  ;;  %v929_v48 = vpop.permute.xlu0 %928  ;;  %1133 = vrot.lane.b32.xlu2 %v2444_v0, %s1884_s5 }
 0x370   : > { %v848_v23 = vmul.f32 %v2661_v10, %v842_v30  ;;  %v849_v39 = vmul.f32 %v2664_v17, %v838_v15  ;;  %v937_v51 = vsel %vm936_vm8, %v921_v53, %v929_v48  ;;  %v941_v4 = vsel %vm936_vm8, %v929_v48, %v921_v53  ;;  %v3186_v53 = vld [vmem:[#allocation16_spill] sm:$0xff] }
 0x371   : > { %v947_v14 = vmul.f32 %v2688_v54, %v937_v51  ;;  %v948_v62 = vmul.f32 %v2691_v32, %v941_v4  ;;  %v931_v13 = vpop.permute.xlu2 %930 }
 0x372   : > { %v872_v43 = vmul.f32 %v3183_v18, %v848_v23  ;;  %v873_v46 = vmul.f32 %v3183_v18, %v849_v39 }
 0x373   : > { %v971_v63 = vmul.f32 %v3185_v27, %v947_v14  ;;  %v972_v31 = vmul.f32 %v3185_v27, %v948_v62  ;;  %v2740_v62 = vld [vmem:[%s3084_s1 + $0x10] sm:$0xff] }
 0x374   : > { %v880_v2 = vadd.f32 %v872_v43, %v813_v61  ;;  %v881_v24 = vadd.f32 %v873_v46, %v814_v5 }
 0x376   : > { %v912_v56 = vadd.f32 %v904_v20, %v880_v2  ;;  %v913_v49 = vadd.f32 %v905_v57, %v881_v24  ;;  %v832_v58 = vpop.permute.xlu1 %831 }
 0x377   : > { %v839_v35 = vsel %vm837_vm7, %v824_v59, %v832_v58  ;;  %v843_v38 = vsel %vm837_vm7, %v832_v58, %v824_v59  ;;  %1135 = vrot.lane.b32.xlu2 %v2435_v19, %s1884_s5  ;;  %v927_v43 = vpop.permute.xlu0 %926  ;;  %v3190_v58 = vld [vmem:[#allocation31_spill] sm:$0xff] }
 0x378   : > { %v850_v55 = vmul.f32 %v2661_v10, %v843_v38  ;;  %v851_v61 = vmul.f32 %v2664_v17, %v839_v35  ;;  %v2721_v5 = vadd.f32 %v971_v63, %v912_v56  ;;  %v2723_v47 = vadd.f32 %v972_v31, %v913_v49 }
 0x379   : > { %v933_v23 = vpop.permute.xlu2 %932 }
 0x37a   : > { %v874_v60 = vmul.f32 %v3186_v53, %v850_v55  ;;  %v875_v15 = vmul.f32 %v3186_v53, %v851_v61 }
 0x37c   : > { %v882_v30 = vadd.f32 %v874_v60, %v815_v41  ;;  %v883_v48 = vadd.f32 %v875_v15, %v816_v33  ;;  %v3187_v41 = vld [vmem:[#allocation13_spill] sm:$0xff] }
 0x37e   : > { %v826_v39 = vpop.permute.xlu1 %825 }
 0x37f   : > { %v840_v59 = vsel %vm837_vm7, %v826_v39, %v2642_v28  ;;  %v844_v51 = vsel %vm837_vm7, %v2642_v28, %v826_v39  ;;  %1245 = vperm.xlu2 %1714, %v2740_v62  }
 0x380   : > { %v852_v4 = vmul.f32 %v2661_v10, %v844_v51  ;;  %v853_v14 = vmul.f32 %v2664_v17, %v840_v59  ;;  %v3188_v10 = vld [vmem:[#allocation29_spill] sm:$0xff] }
 0x381   : > { %v935_v36 = vpop.permute.xlu2 %934  ;;  %v910_v17 = vmul.f32 %v3188_v10, %v2433_v21  ;;  %v911_v57 = vmul.f32 %v3188_v10, %v2435_v19  ;;  %v3193_v10 = vld [vmem:[#allocation20_spill] sm:$0xff] }
 0x382   : > { %v876_v33 = vmul.f32 %v3187_v41, %v852_v4  ;;  %v877_v18 = vmul.f32 %v3187_v41, %v853_v14  ;;  %v940_v2 = vsel %vm936_vm8, %v927_v43, %v935_v36  ;;  %v944_v24 = vsel %vm936_vm8, %v935_v36, %v927_v43 }
 0x383   : > { %v953_v20 = vmul.f32 %v2688_v54, %v940_v2  ;;  %v954_v27 = vmul.f32 %v2691_v32, %v944_v24  ;;  %v918_v31 = vadd.f32 %v910_v17, %v886_v42  ;;  %v919_v56 = vadd.f32 %v911_v57, %v887_v29  ;;  %v3191_v29 = vld [vmem:[#allocation18_spill] sm:$0xff]  ;;  %v990_v2 = vpop.permute.xlu0 %989 }
 0x384   : > { %v884_v46 = vadd.f32 %v876_v33, %v2654_v16  ;;  %v885_v28 = vadd.f32 %v877_v18, %v2656_v12  ;;  %v3189_v16 = vld [vmem:[#allocation19_spill] sm:$0xff] }
 0x385   : > { %v906_v12 = vmul.f32 %v3189_v16, %v2409_v50  ;;  %v907_v63 = vmul.f32 %v3189_v16, %v2425_v37  ;;  %v977_v35 = vmul.f32 %v3190_v58, %v953_v20  ;;  %v978_v38 = vmul.f32 %v3190_v58, %v954_v27 }
 0x386   : > { %v923_v21 = vpop.permute.xlu1 %922  ;;  %v2821_v58 = vperm.slane %v2533_v1, 7 }
 0x387   : > { %v938_v19 = vsel %vm936_vm8, %v923_v21, %v931_v13  ;;  %v942_v49 = vsel %vm936_vm8, %v931_v13, %v923_v21  ;;  %v914_v61 = vadd.f32 %v906_v12, %v882_v30  ;;  %v915_v53 = vadd.f32 %v907_v63, %v883_v48  ;;  %v3192_v48 = vld [vmem:[#allocation15_spill] sm:$0xff] }
 0x388   : > { %v949_v55 = vmul.f32 %v2688_v54, %v938_v19  ;;  %v950_v50 = vmul.f32 %v2691_v32, %v942_v49  ;;  %v2769_v37 = vadd.f32 %v977_v35, %v918_v31  ;;  %v2771_v42 = vadd.f32 %v978_v38, %v919_v56 }
 0x389   : > { %v996_v59 = vpop.permute.xlu2 %995  ;;  %v908_v14 = vmul.f32 %v3192_v48, %v2412_v6  ;;  %v909_v41 = vmul.f32 %v3192_v48, %v2444_v0  ;;  %v2812_v56 = vperm.slane %v2526_v44, 6  ;;  %v2815_v19 = vperm.slane %v2533_v1, 6 }
 0x38a   : > { %v973_v60 = vmul.f32 %v3191_v29, %v949_v55  ;;  %v974_v15 = vmul.f32 %v3191_v29, %v950_v50  ;;  %v2818_v49 = vperm.slane %v2526_v44, 7 }
 0x38b   : > { %v916_v43 = vadd.f32 %v908_v14, %v884_v46  ;;  %v917_v36 = vadd.f32 %v909_v41, %v885_v28  ;;  %v2799_v0 = vpop.permute.xlu0 %991  ;;  %v3195_v14 = vld [vmem:[#allocation38_spill] sm:$0xff] }
 0x38c   : > { %v2775_v39 = vadd.f32 %v973_v60, %v914_v61  ;;  %v2777_v13 = vadd.f32 %v974_v15, %v915_v53  ;;  %v3194_v60 = vld [vmem:[#allocation24_spill] sm:$0xff] }
 0x38e   : > { %v925_v51 = vpop.permute.xlu1 %924 }
 0x38f   : > { %v939_v4 = vsel %vm936_vm8, %v925_v51, %v933_v23  ;;  %v943_v30 = vsel %vm936_vm8, %v933_v23, %v925_v51  ;;  %v2844_v51 = vld [vmem:[%s3085_s2 + $0x18] ss:$0 sm:$0xff] }
 0x390   : > { %v951_v33 = vmul.f32 %v2688_v54, %v939_v4  ;;  %v952_v18 = vmul.f32 %v2691_v32, %v943_v30 }
 0x391   : > { %v2795_v20 = vpop.permute.xlu2 %999 }
 0x392   : > { %v975_v17 = vmul.f32 %v3193_v10, %v951_v33  ;;  %v976_v57 = vmul.f32 %v3193_v10, %v952_v18 }
 0x393   : > { %v2801_v28 = vpop.permute.xlu0 %993 }
 0x394   : > { %v2791_v24 = vadd.f32 %v975_v17, %v916_v43  ;;  %v2793_v23 = vadd.f32 %v976_v57, %v917_v36 }
 0x396   : > { %v988_v6 = vpop.permute.xlu1 %987 }
 0x397   : > { %v1004_v21 = vsel %vm1003_vm9, %v988_v6, %v996_v59  ;;  %v1008_v31 = vsel %vm1003_vm9, %v996_v59, %v988_v6  ;;  %v2839_v59 = vld [vmem:[%s3085_s2 + $0x10] ss:$0 sm:$0xff] }
 0x398   : > { %v1014_v38 = vmul.f32 %v2812_v56, %v1004_v21  ;;  %v1015_v55 = vmul.f32 %v2815_v19, %v1008_v31 }
 0x399   : > { %v2797_v27 = vpop.permute.xlu2 %1001 }
 0x39a   : > { %v1038_v1 = vmul.f32 %v3194_v60, %v1014_v38  ;;  %v1039_v15 = vmul.f32 %v3194_v60, %v1015_v55 }
 0x39b   : > { %v1057_v63 = vpop.permute.xlu0 %1056 }
 0x39c   : > { %v1046_v43 = vadd.f32 %v1038_v1, %v2721_v5  ;;  %v1047_v36 = vadd.f32 %v1039_v15, %v2723_v47  ;;  %v3196_v5 = vld [vmem:[#allocation37_spill] sm:$0xff] }
 0x39d   : > { %v1228_v47 = vmul.f32 %v3196_v5, %v2357_v40  ;;  %v3198_v40 = vld [vmem:[#allocation22_spill] sm:$0xff] }
 0x39e   : > { %v998_v54 = vpop.permute.xlu1 %997 }
 0x39f   : > { %v1005_v30 = vsel %vm1003_vm9, %v990_v2, %v998_v54  ;;  %v1009_v48 = vsel %vm1003_vm9, %v998_v54, %v990_v2  ;;  %v1252_v15 = vadd.f32 %v2492_v25, %v1228_v47 }
 0x3a0   : > { %v1016_v21 = vmul.f32 %v2812_v56, %v1005_v30  ;;  %v1017_v31 = vmul.f32 %v2815_v19, %v1009_v48  ;;  %v3199_v48 = vld [vmem:[#allocation40_spill] sm:$0xff] }
 0x3a1   : > { %v1063_v32 = vpop.permute.xlu2 %1062 }
 0x3a2   : > { %v1040_v1 = vmul.f32 %v3198_v40, %v1016_v21 }
 0x3a3   : > { %v1130_v4 = vpop.permute.xlu0 %1129 }
 0x3a6   : > { %v1055_v46 = vpop.permute.xlu1 %1054 }
 0x3a7   : > { %v1071_v50 = vsel %vm1070_vm10, %v1055_v46, %v1063_v32  ;;  %v1075_v61 = vsel %vm1070_vm10, %v1063_v32, %v1055_v46  ;;  %v1229_v46 = vmul.f32 %v3196_v5, %v2366_v8  ;;  %v1041_v8 = vmul.f32 %v3198_v40, %v1017_v31 }
 0x3a8   : > { %v1081_v29 = vmul.f32 %v2818_v49, %v1071_v50  ;;  %v1082_v44 = vmul.f32 %v2821_v58, %v1075_v61  ;;  %v3197_v50 = vld [vmem:[#allocation41_spill] sm:$0xff] }
 0x3a9   : > { %v2803_v16 = vpop.permute.xlu2 %1058 }
 0x3aa   : > { %v1105_v41 = vmul.f32 %v3195_v14, %v1081_v29  ;;  %v1106_v33 = vmul.f32 %v3195_v14, %v1082_v44 }
 0x3ac   : > { %v1113_v38 = vadd.f32 %v1105_v41, %v1046_v43  ;;  %v1114_v55 = vadd.f32 %v1106_v33, %v1047_v36  ;;  %v3200_v33 = vld [vmem:[#allocation27_spill] sm:$0xff] }
 0x3ae   : > { %v1065_v12 = vpop.permute.xlu1 %1064 }
 0x3af   : > { %v1072_v57 = vsel %vm1070_vm10, %v1057_v63, %v1065_v12  ;;  %v1076_v2 = vsel %vm1070_vm10, %v1065_v12, %v1057_v63 }
 0x3b0   : > { %v1083_v63 = vmul.f32 %v2818_v49, %v1072_v57  ;;  %v1084_v29 = vmul.f32 %v2821_v58, %v1076_v2  ;;  %v3201_v57 = vld [vmem:[#allocation43_spill] sm:$0xff] }
 0x3b1   : > { %v2823_v35 = vpop.permute.xlu2 %1060  ;;  %v1230_v2 = vmul.f32 %v3201_v57, %v2338_v9 }
 0x3b2   : > { %v1108_v43 = vmul.f32 %v3200_v33, %v1084_v29 }
 0x3b6   : > { %v1067_v53 = vpop.permute.xlu1 %1066 }
 0x3b9   : > { %v1122_v18 = vpop.permute.xlu2 %1121 }
 0x3ba   : > { %v1138_v10 = vsel %vm1137_vm11, %v1122_v18, %v1130_v4  ;;  %v1142_v17 = vsel %vm1137_vm11, %v1130_v4, %v1122_v18  ;;  %v1253_v4 = vadd.f32 %v2492_v25, %v1229_v46  ;;  %v1107_v18 = vmul.f32 %v3200_v33, %v1083_v63  ;;  %v3203_v63 = vld [vmem:[#allocation44_spill] sm:$0xff] }
 0x3bb   : > { %v1148_v6 = vmul.f32 %v2839_v59, %v1138_v10  ;;  %v1149_v54 = vmul.f32 %v2844_v51, %v1142_v17  ;;  %v1231_v25 = vmul.f32 %v3201_v57, %v2348_v52  ;;  %v1006_v52 = vsel %vm1003_vm9, %v2799_v0, %v2795_v20 }
 0x3bc   : > { %v1254_v29 = vadd.f32 %v3203_v63, %v1230_v2 }
 0x3bd   : > { %v1172_v61 = vmul.f32 %v3197_v50, %v1148_v6  ;;  %v1173_v12 = vmul.f32 %v3197_v50, %v1149_v54  ;;  %v1048_v6 = vadd.f32 %v1040_v1, %v2775_v39  ;;  %v1049_v54 = vadd.f32 %v1041_v8, %v2777_v13  ;;  %v3202_v50 = vld [vmem:[#allocation30_spill] sm:$0xff] }
 0x3be   : > { %v1069_v32 = vpop.permute.xlu1 %1068  ;;  %v1010_v39 = vsel %vm1003_vm9, %v2795_v20, %v2799_v0  ;;  %v1007_v20 = vsel %vm1003_vm9, %v2801_v28, %v2797_v27  ;;  %v1011_v0 = vsel %vm1003_vm9, %v2797_v27, %v2801_v28  ;;  %v1018_v8 = vmul.f32 %v2812_v56, %v1006_v52 }
 0x3bf   : > { %v1180_v44 = vadd.f32 %v1172_v61, %v1113_v38  ;;  %v1181_v60 = vadd.f32 %v1173_v12, %v1114_v55  ;;  %v1115_v13 = vadd.f32 %v1107_v18, %v1048_v6  ;;  %v1116_v31 = vadd.f32 %v1108_v43, %v1049_v54  ;;  %v3206_v54 = vld [vmem:[#allocation28_spill] sm:$0xff] }
 0x3c0   : > { %v1073_v38 = vsel %vm1070_vm10, %v2803_v16, %v1067_v53  ;;  %v1077_v55 = vsel %vm1070_vm10, %v1067_v53, %v2803_v16  ;;  %v1074_v16 = vsel %vm1070_vm10, %v2823_v35, %v1069_v32  ;;  %v1078_v53 = vsel %vm1070_vm10, %v1069_v32, %v2823_v35  ;;  %v1128_v32 = vpop.permute.xlu0 %1127 }
 0x3c1   : > { %v1132_v30 = vpop.permute.xlu2 %1131  ;;  %v1204_v14 = vadd.f32 %v3199_v48, %v1180_v44  ;;  %v1205_v41 = vadd.f32 %v3199_v48, %v1181_v60  ;;  %v1255_v44 = vadd.f32 %v3203_v63, %v1231_v25  ;;  %v1085_v27 = vmul.f32 %v2818_v49, %v1073_v38  ;;  %v3205_v25 = vld [vmem:[#allocation35_spill] sm:$0xff] }
 0x3c2   : > { %v1086_v28 = vmul.f32 %v2821_v58, %v1077_v55  ;;  %v1087_v33 = vmul.f32 %v2818_v49, %v1074_v16  ;;  %v1088_v18 = vmul.f32 %v2821_v58, %v1078_v53  ;;  %v1042_v6 = vmul.f32 %v3205_v25, %v1018_v8  ;;  %v3209_v55 = vld [vmem:[#allocation32_spill] sm:$0xff] }
 0x3c3   : > { %v2882_v36 = vmul.f32 %v1252_v15, %v1204_v14  ;;  %v2884_v10 = vmul.f32 %v1253_v4, %v1205_v41  ;;  %v1019_v15 = vmul.f32 %v2815_v19, %v1010_v39  ;;  %v1020_v4 = vmul.f32 %v2812_v56, %v1007_v20  ;;  %v3204_v14 = vld [vmem:[#allocation39_spill] sm:$0xff] }
 0x3c4   : > { %v1109_v58 = vmul.f32 %v3206_v54, %v1085_v27  ;;  %v1050_v52 = vadd.f32 %v1042_v6, %v2791_v24 }
 0x3c5   : > { %v1268_v46 = vadd.f32 %v2884_v10, %v2882_v36  ;;  %v1043_v49 = vmul.f32 %v3205_v25, %v1019_v15 }
 0x3c6   : > { %v1124_v17 = vpop.permute.xlu1 %1123  ;;  %v1117_v20 = vadd.f32 %v1109_v58, %v1050_v52 }
 0x3c7   : > { %v1139_v5 = vsel %vm1137_vm11, %v1124_v17, %v1132_v30  ;;  %v1143_v47 = vsel %vm1137_vm11, %v1132_v30, %v1124_v17  ;;  %1269 = vadd.xlane.f32.xlu2 %v1268_v46  ;;  %v1021_v30 = vmul.f32 %v2815_v19, %v1011_v0  ;;  %v1051_v39 = vadd.f32 %v1043_v49, %v2793_v23 }
 0x3c8   : > { %v1150_v21 = vmul.f32 %v2839_v59, %v1139_v5  ;;  %v1151_v9 = vmul.f32 %v2844_v51, %v1143_v47  ;;  %v1110_v5 = vmul.f32 %v3206_v54, %v1086_v28  ;;  %v3207_v47 = vld [vmem:[#allocation25_spill] sm:$0xff]  ;;  %v1250_v28 = vpop.permute.xlu0 %1249 }
 0x3c9   : > { %v1134_v1 = vpop.permute.xlu2 %1133  ;;  %v1044_v46 = vmul.f32 %v3207_v47, %v1020_v4 }
 0x3ca   : > { %v1174_v61 = vmul.f32 %v3202_v50, %v1150_v21  ;;  %v1175_v12 = vmul.f32 %v3202_v50, %v1151_v9  ;;  %v1045_v21 = vmul.f32 %v3207_v47, %v1021_v30  ;;  %v1111_v50 = vmul.f32 %v3209_v55, %v1087_v33  ;;  %v3211_v30 = vld [vmem:[#allocation42_spill] sm:$0xff] }
 0x3cb   : > { %v1118_v0 = vadd.f32 %v1110_v5, %v1051_v39  ;;  %v1052_v23 = vadd.f32 %v1044_v46, %v2769_v37  ;;  %v1235_v37 = vmul.f32 %v3211_v30, %v2354_v11  ;;  %v3213_v46 = vld [vmem:[#allocation8_spill] sm:$0xff] }
 0x3cc   : > { %v1182_v60 = vadd.f32 %v1174_v61, %v1115_v13  ;;  %v1183_v40 = vadd.f32 %v1175_v12, %v1116_v31  ;;  %v3208_v13 = vld [vmem:[#allocation34_spill] sm:$0xff]  ;;  %v1112_v61 = vmul.f32 %v3209_v55, %v1088_v18  ;;  %v3215_v55 = vld [vmem:[#allocation9_spill] sm:$0xff] }
 0x3cd   : > { %v1119_v15 = vadd.f32 %v1111_v50, %v1052_v23  ;;  %v1259_v18 = vadd.f32 %v1250_v28, %v1235_v37 }
 0x3ce   : > { %v1126_v48 = vpop.permute.xlu1 %1125  ;;  %v1206_v41 = vadd.f32 %v3204_v14, %v1182_v60  ;;  %v1207_v35 = vadd.f32 %v3204_v14, %v1183_v40  ;;  %v3210_v40 = vld [vmem:[#allocation33_spill] sm:$0xff] }
 0x3cf   : > { %v1140_v43 = vsel %vm1137_vm11, %v1126_v48, %v1134_v1  ;;  %v1144_v17 = vsel %vm1137_vm11, %v1134_v1, %v1126_v48  ;;  %v1234_v48 = vmul.f32 %v3211_v30, %v2344_v34 }
 0x3d0   : > { %v1152_v56 = vmul.f32 %v2839_v59, %v1140_v43  ;;  %v1153_v19 = vmul.f32 %v2844_v51, %v1144_v17  ;;  %v2948_v57 = vmul.f32 %v1254_v29, %v1206_v41  ;;  %v2950_v2 = vmul.f32 %v1255_v44, %v1207_v35 }
 0x3d1   : > { %v1136_v12 = vpop.permute.xlu2 %1135  ;;  %v1053_v29 = vadd.f32 %v1045_v21, %v2771_v42  ;;  %v1258_v33 = vadd.f32 %v1250_v28, %v1234_v48 }
 0x3d2   : > { %v1271_v9 = vadd.f32 %v2950_v2, %v2948_v57  ;;  %v1176_v31 = vmul.f32 %v3208_v13, %v1152_v56  ;;  %v1177_v38 = vmul.f32 %v3208_v13, %v1153_v19  ;;  %v1141_v63 = vsel %vm1137_vm11, %v1128_v32, %v1136_v12 }
 0x3d3   : > { %v1145_v24 = vsel %vm1137_vm11, %v1136_v12, %v1128_v32  ;;  %v1154_v44 = vmul.f32 %v2839_v59, %v1141_v63  ;;  %v1120_v27 = vadd.f32 %v1112_v61, %v1053_v29  ;;  %v1757_v63 = vld [vmem:[%s3084_s1] sm:$0xff] }
 0x3d4   : > { %1272 = vadd.xlane.f32.xlu1 %v1271_v9  ;;  %v1155_v16 = vmul.f32 %v2844_v51, %v1145_v24  ;;  %v1184_v53 = vadd.f32 %v1176_v31, %v1117_v20  ;;  %v1185_v60 = vadd.f32 %v1177_v38, %v1118_v0  ;;  %v3212_v51 = vld [vmem:[#allocation36_spill] sm:$0xff]  ;;  %v3214_v31 = vld [vmem:[#allocation10_spill] sm:$0xff]  ;;  %v1885_v0 = vmov 16   ;;  %v3216_v24 = vld [vmem:[#allocation11_spill] sm:$0xff] }
 0x3d5   : > { %v1178_v1 = vmul.f32 %v3210_v40, %v1154_v44  ;;  %v1232_v14 = vmul.f32 %v3212_v51, %v2341_v7  ;;  %v1233_v41 = vmul.f32 %v3212_v51, %v2351_v3  ;;  %1715 = vset.pattern.permute.xlu2 %v1885_v0  ;;  %1716 = vset.pattern.permute.xlu1 %v1885_v0  ;;  %v1886_v44 = vmov 17  }
 0x3d6   : > { %v1179_v8 = vmul.f32 %v3210_v40, %v1155_v16  ;;  %v1202_v4 = vpop.permute.xlu1 %1201  ;;  %v1208_v35 = vadd.f32 %v2488_v22, %v1184_v53  ;;  %v1209_v32 = vadd.f32 %v2488_v22, %v1185_v60  ;;  %v3217_v16 = vld [vmem:[#allocation12_spill] sm:$0xff] }
 0x3d7   : > { %v1186_v42 = vadd.f32 %v1178_v1, %v1119_v15 }
 0x3d8   : > { %v1187_v59 = vadd.f32 %v1179_v8, %v1120_v27 }
 0x3d9   : > { %v1210_v43 = vadd.f32 %v1202_v4, %v1186_v42  ;;  %v1246_v34 = vpop.permute.xlu2 %1245 }
 0x3da   : > { %v1211_v17 = vadd.f32 %v1202_v4, %v1187_v59  ;;  %v1256_v56 = vadd.f32 %v1246_v34, %v1232_v14  ;;  %v1257_v19 = vadd.f32 %v1246_v34, %v1233_v41  ;;  %v3218_v14 = vld [vmem:[#allocation17_spill] sm:$0xff] }
 0x3db   : > { %v2986_v11 = vmul.f32 %v1258_v33, %v1210_v43 }
 0x3dc   : > { %v2988_v25 = vmul.f32 %v1259_v18, %v1211_v17  ;;  %v2990_v6 = vmul.f32 %v1256_v56, %v1208_v35  ;;  %v2992_v7 = vmul.f32 %v1257_v19, %v1209_v32 }
 0x3de   : > { %v1277_v3 = vadd.f32 %v2988_v25, %v2986_v11  ;;  %v1274_v22 = vadd.f32 %v2992_v7, %v2990_v6 }
 0x3e0   : > { %1278 = vadd.xlane.f32.xlu2 %v1277_v3  ;;  %1275 = vadd.xlane.f32.xlu0 %v1274_v22 }
 0x3f8   : > { %1394 = vperm.xlu2 %1715, %v1757_v63  }
 0x400   : > { %1402 = vperm.xlu2 %1715, %v2740_v62  }
 0x408   : > { %1720 = vset.pattern.permute.xlu2 %v1886_v44 }
 0x43a   : > { %v1270_v49 = vpop.xlane.xlu2 %1269 }
 0x43b   : > { %v1280_v5 = vmul.f32 0.00390625, %v1270_v49 }
 0x43d   : > { %v1288_v13 = vperm.slane %v1280_v5, %v2063_v26  ;;  %v1758_v26 = vld [vmem:[%s3084_s1 + $0x8] sm:$0xff]  ;;  %v3220_v5 = vld [vmem:[#allocation48_spill] sm:$0xff] }
 0x43e   : > { %1398 = vperm.xlu1 %1716, %v1758_v26   ;;  %1422 = vperm.xlu2 %1720, %v1758_v26  }
 0x446   : > { %1406 = vperm.xlu1 %1716, %v2575_v45   ;;  %1721 = vset.pattern.permute.xlu2 %v3217_v16 }
 0x447   : > { %v1273_v54 = vpop.xlane.xlu1 %1272 }
 0x448   : > { %v1281_v58 = vmul.f32 0.00390625, %v1273_v54  ;;  %v3219_v54 = vld [vmem:[#allocation47_spill] sm:$0xff] }
 0x44a   : > { %v1289_v21 = vperm.slane %v1281_v58, %v3213_v46 }
 0x44c   : > { %v1290_v61 = vsel %vm232_vm0, %v1289_v21, %v1288_v13 }
 0x44e   : > { %1717 = vset.pattern.permute.xlu1 %v3216_v24  ;;  %v3223_v24 = vld [vmem:[#allocation51_spill] sm:$0xff] }
 0x453   : > { %v1279_v47 = vpop.xlane.xlu2 %1278  ;;  %v1276_v9 = vpop.xlane.xlu0 %1275 }
 0x454   : > { %v1283_v52 = vmul.f32 0.00390625, %v1279_v47  ;;  %v1282_v39 = vmul.f32 0.00390625, %v1276_v9  ;;  %v3221_v9 = vld [vmem:[#allocation45_spill] sm:$0xff] }
 0x456   : > { %v1293_v38 = vperm.slane %v1283_v52, %v3214_v31  ;;  %v1291_v50 = vperm.slane %v1282_v39, %v3215_v55  ;;  %v3222_v39 = vld [vmem:[#allocation46_spill] sm:$0xff] }
 0x458   : > { %v1292_v12 = vsel %vm236_vm1, %v1291_v50, %v1290_v61 }
 0x459   : > { %v1294_v20 = vsel %vm240_vm3, %v1293_v38, %v1292_v12 }
 0x45a   : > { %1562 = vmatmul.msk.f32.vlgmr.msra.gmra.mxu2 %vm258_vm4, %v1294_v20 }
 0x45b   : > { %v1395_v41 = vpop.permute.xlu2 %1394 }
 0x463   : > { %v1403_v32 = vpop.permute.xlu2 %1402 }
 0x498   : > { %v1423_v43 = vpop.permute.xlu2 %1422 }
 0x4b0   : > { %v1399_v35 = vpop.permute.xlu1 %1398 }
 0x4b8   : > { %v1407_v33 = vpop.permute.xlu1 %1406 }
 0x4dd   : > { %v1314_v23 = vpop.f32.mrf.mxu2 }
 0x4de   : > { %v1317_v29 = vmax.f32 %v1314_v23, 0.0 }
 0x4e0   : > { %1567 = vmatmul.msk.f32.vlgmr.msra.gmra.mxu3 %vm290_vm2, %v1317_v29  ;;  %v3224_v29 = vld [vmem:[#allocation52_spill] sm:$0xff] }
 0x563   : > { %v1338_v53 = vpop.f32.mrf.mxu3 }
 0x564   : > { %v1568_v60 = vmul.f32 -1.442695, %v1338_v53  ;;  %v3225_v53 = vld [vmem:[#allocation49_spill] sm:$0xff] }
 0x566   : > { %1751 = vpow2.f32 %v1568_v60 }
 0x56c   : > { %v1752_v40 = vpop.eup %1751 }
 0x56d   : > { %v1344_v1 = vadd.f32 1.0, %v1752_v40  ;;  %v3226_v40 = vld [vmem:[#allocation50_spill] sm:$0xff] }
 0x56f   : > { %1753 = vrcp.f32 %v1344_v1  ;;  %v1356_v28 = vand.u32 2147483648, %v1344_v1  ;;  %v1354_v30 = vand.u32 2147483647, %v1344_v1  ;;  %vm1350_vm1 = vweird.f32 %v1344_v1 }
 0x571   : > { %v1357_v37 = vor.u32 1.1754944e-38, %v1356_v28  ;;  %vm1355_vm3 = vcmp.eq.f32.partialorder %v1354_v30, 8.507059e+37 }
 0x575   : > { %v1754_v8 = vpop.eup %1753 }
 0x576   : > { %v1346_v15 = vmul.f32 %v1754_v8, %v1344_v1  ;;  %vm1351_vm0 = vweird.f32 %v1754_v8 }
 0x577   : > { %vm1352_vm2 = vmor %vm1350_vm1, %vm1351_vm0 }
 0x578   : > { %v1347_v27 = vsub.f32 1.0, %v1346_v15 }
 0x57a   : > { %v1348_v4 = vmul.f32 %v1754_v8, %v1347_v27 }
 0x57c   : > { %v1349_v48 = vadd.f32 %v1754_v8, %v1348_v4 }
 0x57e   : > { %v1353_v42 = vsel %vm1352_vm2, %v1754_v8, %v1349_v48 }
 0x57f   : > { %v1358_v59 = vsel %vm1355_vm3, %v1357_v37, %v1353_v42 }
 0x580   : > { %v1360_v51 = vperm.slane %v1358_v59, 0 }
 0x582   : > { %1377 = vperm.xlu2 %1721, %v1360_v51   ;;  %1371 = vperm.xlu0 %1718, %v1360_v51  }
 0x583   : > { %1365 = vperm.xlu1 %1717, %v1360_v51  }
 0x58a   : > { %1719 = vset.pattern.permute.xlu0 %v1886_v44  ;;  %1724 = vset.pattern.permute.xlu2 %v1886_v44 }
 0x58b   : > { %1722 = vset.pattern.permute.xlu1 %v3218_v14  ;;  %1418 = vperm.xlu0 %1719, %v1757_v63  }
 0x58c   : > { %1430 = vperm.xlu2 %1724, %v2575_v45  }
 0x593   : > { %1383 = vperm.xlu1 %1722, %v1360_v51  }
 0x59b   : > { %1723 = vset.pattern.permute.xlu1 %v1886_v44 }
 0x59c   : > { %1426 = vperm.xlu1 %1723, %v2740_v62  }
 0x5f4   : > { %v1372_v18 = vpop.permute.xlu0 %1371 }
 0x5f5   : > { %v1387_v17 = vmul.f32 %v1372_v18, %v2948_v57  ;;  %v1388_v34 = vmul.f32 %v1372_v18, %v2950_v2  ;;  %v1366_v56 = vpop.permute.xlu1 %1365  ;;  %v1378_v2 = vpop.permute.xlu2 %1377 }
 0x5f6   : > { %v1385_v45 = vmul.f32 %v1366_v56, %v2882_v36  ;;  %v1386_v22 = vmul.f32 %v1366_v56, %v2884_v10  ;;  %v1389_v20 = vmul.f32 %v1378_v2, %v2990_v6  ;;  %v1390_v0 = vmul.f32 %v1378_v2, %v2992_v7 }
 0x5f7   : > { %v1411_v19 = vmul.f32 %v1399_v35, %v1387_v17  ;;  %v1412_v3 = vmul.f32 %v1399_v35, %v1388_v34 }
 0x5f8   : > { %v1409_v46 = vmul.f32 %v1395_v41, %v1385_v45  ;;  %v1410_v21 = vmul.f32 %v1395_v41, %v1386_v22 }
 0x5f9   : > { %v1435_v49 = vadd.f32 %v1423_v43, %v1411_v19  ;;  %v1436_v62 = vadd.f32 %v1423_v43, %v1412_v3 }
 0x5fb   : > { %v1443_v58 = vadd.f32 %v1435_v49, %v3219_v54  ;;  %v1444_v47 = vadd.f32 %v1436_v62, %v3220_v5 }
 0x5fd   : > { %1451 = vst [vmem:[%s3028_s8 + $0x10] sm:$0xff] %v1443_v58  ;;  %v1419_v57 = vpop.permute.xlu0 %1418  ;;  %v1431_v50 = vpop.permute.xlu2 %1430 }
 0x5fe   : > { %1452 = vst [vmem:[%s3028_s8 + $0x18] sm:$0xff] %v1444_v47  ;;  %v1433_v36 = vadd.f32 %v1419_v57, %v1409_v46  ;;  %v1434_v10 = vadd.f32 %v1419_v57, %v1410_v21 }
 0x600   : > { %v1441_v52 = vadd.f32 %v1433_v36, %v3221_v9  ;;  %v1442_v13 = vadd.f32 %v1434_v10, %v3222_v39 }
 0x602   : > { %1449 = vst [vmem:[%s3028_s8] sm:$0xff] %v1441_v52 }
 0x603   : > { %1450 = vst [vmem:[%s3028_s8 + $0x8] sm:$0xff] %v1442_v13 }
 0x605   : > { %v1384_v31 = vpop.permute.xlu1 %1383 }
 0x606   : > { %v1391_v38 = vmul.f32 %v1384_v31, %v2986_v11  ;;  %v1392_v55 = vmul.f32 %v1384_v31, %v2988_v25  ;;  %v1413_v11 = vmul.f32 %v1403_v32, %v1389_v20  ;;  %v1414_v25 = vmul.f32 %v1403_v32, %v1390_v0 }
 0x608   : > { %v1415_v61 = vmul.f32 %v1407_v33, %v1391_v38  ;;  %v1416_v12 = vmul.f32 %v1407_v33, %v1392_v55 }
 0x60a   : > { %v1439_v63 = vadd.f32 %v1431_v50, %v1415_v61  ;;  %v1440_v26 = vadd.f32 %v1431_v50, %v1416_v12 }
 0x60c   : > { %v1447_v23 = vadd.f32 %v1439_v63, %v3223_v24  ;;  %v1448_v44 = vadd.f32 %v1440_v26, %v3224_v29 }
 0x60e   : > { %1455 = vst [vmem:[%s3028_s8 + $0x30] sm:$0xff] %v1447_v23  ;;  %v1427_v6 = vpop.permute.xlu1 %1426 }
 0x60f   : > { %1456 = vst [vmem:[%s3028_s8 + $0x38] sm:$0xff] %v1448_v44  ;;  %v1437_v7 = vadd.f32 %v1427_v6, %v1413_v11  ;;  %v1438_v16 = vadd.f32 %v1427_v6, %v1414_v25 }
 0x611   : > { %v1445_v60 = vadd.f32 %v1437_v7, %v3225_v53  ;;  %v1446_v1 = vadd.f32 %v1438_v16, %v3226_v40 }
 0x613   : > { %1453 = vst [vmem:[%s3028_s8 + $0x20] sm:$0xff] %v1445_v60 }
 0x614   : > { %1454 = vst [vmem:[%s3028_s8 + $0x28] sm:$0xff] %v1446_v1 }
 0x615   : > { %1816 = shalt.err (!%p1813_p4)
}
 0x616   : > { %s1887_s29 = smov 256  }
 0x617   : > { %1578 = dma.vmem_to_hbm [thread:$0]  (%p1958_p11), %s1471_s17, 1024, %s1473_s16, %s1458_s19, %s1887_s29, %s1887_s29, %s1878_s27  }
 0x618 PF: > { %s1487_s5 = sand.u32 1, %s1843_s12   ;;  %p3227_p7 = scmp.ge.s32.totalorder %s1855_s15, 2 }
 0x619   : > { %s1488_s7 = scalar_lea.sflag [#allocation4], %s1487_s5 }
 0x61a   : > { %p1585_p5 = pnand %p3227_p7, %p1962_p12 }
 0x61c   : > { %p1586_p8 = pneg %p1585_p5 }
 0x61e   : > { %1838 = dma.done.wait (%p1586_p8), %s1488_s7, 1024  }
 0x61f   : > { %1840 = vsyncadd (%p1586_p8), %s1488_s7, 4294966272  ;;  %p16_p10 = scmp.ge.s32.totalorder %s1933_s18, 4   ;;  %s3228_s12 = smov %s1847_s13 }
 0x620   : > { %s3229_s13 = smov %s1851_s14  ;;  %s3230_s14 = smov %s1945_s21 }
 0x621   : > { %s3231_s15 = smov %s1933_s18  ;;  %18 = sbr.rel (!%p16_p10) target bundleno = 5 (0x5), region = 77 }
 0x626   :  { %1494 = vsyncpa [#allocation3], 1 }
 0x627   :  { %1496 = vsyncpa [#allocation3 + $0x1], 1 }
 0x628   :  { %1497 = vsyncpa [#allocation4], 1 }
 0x629   :  { %1499 = vsyncpa [#allocation4 + $0x1], 1 }

</bundles_post_ra>
